<compile_context>
chip_gen: v7x
topology: tpu7x:2x2x1
jax: 0.10.0
libtpu: 0.0.40
codegen_flags: <defaults>
</compile_context>

<pallas_src>
import functools

import jax
import jax.numpy as jnp
from jax import lax
from jax.experimental import pallas as pl
from jax.experimental.pallas import tpu as pltpu
import numpy as np


_NEG_FILL = -10000.0


def _aoa_kernel(len_ref,    # VMEM (Bb, 1, 1) int32  -- seq_length per batch row
                seq_ref,    # VMEM (Bb, S, H) f32
                tgt_ref,    # VMEM (Bb, T, H) f32
                rep_ref,    # VMEM out (Bb, 1, H) f32
                ats_ref):   # VMEM out (Bb, T, S) f32
    seq = seq_ref[...]                                   # (Bb, S, H)
    tgt = tgt_ref[...]                                   # (Bb, T, H)
    L = len_ref[...]                                     # (Bb, 1, 1) int32
    S = seq.shape[1]
    T = tgt.shape[1]
    neg = jnp.float32(_NEG_FILL)

    # input_weight = bmm(target_vec, seq_out^T)  -> (Bb, T, S)
    # TODO(synk): optional bf16 cast of the matmul operands (keep f32 accum)
    # would help v6e/v7x MXU throughput but changes score precision.
    w = jnp.einsum('bth,bsh->bts', tgt, seq,
                   preferred_element_type=jnp.float32)

    # ---- mask along S with seq_length (equivalent of the in-place masked_fill_)
    s_idx = lax.broadcasted_iota(jnp.int32, (1, 1, S), 2)
    w = jnp.where(s_idx < L, w, neg)                     # (Bb, T, S)

    # ---- softmax over S (lane axis): align_weight_target_seq
    m1 = jnp.max(w, axis=-1, keepdims=True)              # (Bb, T, 1)
    e1 = jnp.exp(w - m1)
    inv1 = pl.reciprocal(jnp.sum(e1, axis=-1, keepdims=True), approx=True)
    a_ts = e1 * inv1                                     # (Bb, T, S)
    ats_ref[...] = a_ts

    # ---- second softmax: PyTorch transposes the (already S-masked) scores,
    # masks along T (STILL with seq_length -- closure bug), softmaxes over T.
    # In (T, S) orientation this is a row mask + an axis=1 (sublane) softmax;
    # A_st is never materialized.
    t_idx = lax.broadcasted_iota(jnp.int32, (1, T, 1), 1)
    w2 = jnp.where(t_idx < L, w, neg)                    # (Bb, T, S)
    m2 = jnp.max(w2, axis=1, keepdims=True)              # (Bb, 1, S)
    e2 = jnp.exp(w2 - m2)
    inv2 = pl.reciprocal(jnp.sum(e2, axis=1, keepdims=True), approx=True)

    # align_weight[b, t] = sum_s A_st[b, s, t] / seq_length[b]
    inv_len = pl.reciprocal(L.astype(jnp.float32), approx=True)    # (Bb,1,1)
    aw = jnp.sum(e2 * inv2, axis=-1, keepdims=True) * inv_len      # (Bb,T,1)

    # final_representation[b,h] = sum_t aw[b,t] * sum_s A_ts[b,t,s] * seq[b,s,h]
    p = jnp.einsum('bts,bsh->bth', a_ts, seq,
                   preferred_element_type=jnp.float32)             # (Bb,T,H)
    rep_ref[...] = jnp.sum(p * aw, axis=1, keepdims=True)          # (Bb,1,H)


def _choose_block_b(B, S, T, H):
    """Batch rows per grid step: as large as comfortably fits VMEM on all gens."""
    if B <= 8:
        return B
    # bytes per batch row: double-buffered I/O + ~5 score-size f32 temporaries.
    per_batch = 4 * (2 * (S * H + T * H + T * S + H + 1) + 5 * T * S + 2 * T * H)
    bb = int(max(8, min((24 << 20) // max(per_batch, 1), 256)))
    bb -= bb % 8
    return int(min(bb, -(-B // 8) * 8))


@jax.jit
def aoa_attention(seq_out, seq_length, target_vec, target_length):
    """Returns (final_representation (B,H), align_weight_target_seq (B,T,S))."""
    del target_length  # never used by the original module's math (closure bug)
    B, S, H = seq_out.shape
    T = target_vec.shape[1]

    bb = _choose_block_b(B, S, T, H)
    n_blocks = -(-B // bb)
    Bp = n_blocks * bb
    if Bp != B:
        pad = Bp - B
        seq_out = jnp.pad(seq_out, ((0, pad), (0, 0), (0, 0)))
        target_vec = jnp.pad(target_vec, ((0, pad), (0, 0), (0, 0)))
        # Pad lengths with 1 (not 0) so padded rows stay finite; they are
        # sliced off below.
        seq_length = jnp.pad(seq_length.astype(jnp.int32), (0, pad),
                             constant_values=1)
    lens = seq_length.astype(jnp.int32).reshape(Bp, 1, 1)

    # VMEM budget: double-buffered blocks + in-kernel temporaries + headroom,
    # capped at 64 MiB so the same plan is legal on v7x as well as v5e/v6e.
    per_step = 4 * bb * (2 * (S * H + T * H + T * S + H + 1)
                         + 5 * T * S + 2 * T * H)
    vmem_limit = int(min(max(per_step + (4 << 20), 32 << 20), 64 << 20))

    rep, a_ts = pl.pallas_call(
        _aoa_kernel,
        out_shape=(
            jax.ShapeDtypeStruct((Bp, 1, H), jnp.float32),
            jax.ShapeDtypeStruct((Bp, T, S), jnp.float32),
        ),
        grid=(n_blocks,),
        in_specs=[
            pl.BlockSpec((bb, 1, 1), lambda i: (i, 0, 0)),
            pl.BlockSpec((bb, S, H), lambda i: (i, 0, 0)),
            pl.BlockSpec((bb, T, H), lambda i: (i, 0, 0)),
        ],
        out_specs=(
            pl.BlockSpec((bb, 1, H), lambda i: (i, 0, 0)),
            pl.BlockSpec((bb, T, S), lambda i: (i, 0, 0)),
        ),
        compiler_params=pltpu.CompilerParams(
            dimension_semantics=("parallel",),
            vmem_limit_bytes=vmem_limit),
    )(lens, seq_out, target_vec)

    return rep.reshape(Bp, H)[:B], a_ts[:B]


def aoa_attention_ref(seq_out, seq_length, target_vec, target_length):
    """Pure-JAX reference mirroring the PyTorch module exactly."""
    del target_length
    S = seq_out.shape[1]
    T = target_vec.shape[1]
    W = jnp.einsum('bth,bsh->bts', target_vec, seq_out)               # (B,T,S)
    mask_s = jnp.arange(S)[None, None, :] < seq_length[:, None, None]
    Wm = jnp.where(mask_s, W, -10000.0)
    A_ts = jax.nn.softmax(Wm, axis=-1)                                # (B,T,S)
    Wt = jnp.swapaxes(Wm, 1, 2)                                       # (B,S,T)
    mask_t = jnp.arange(T)[None, None, :] < seq_length[:, None, None]
    Wtm = jnp.where(mask_t, Wt, -10000.0)
    A_st = jax.nn.softmax(Wtm, axis=-1)                               # (B,S,T)
    aw = jnp.sum(A_st, axis=1) / seq_length[:, None].astype(jnp.float32)
    final_att = jnp.einsum('bts,bt->bs', A_ts, aw)                    # (B,S)
    rep = jnp.einsum('bsh,bs->bh', seq_out, final_att)                # (B,H)
    return rep, A_ts


if __name__ == "__main__":
    B, S, T, H = 10, 16, 8, 32

    key = jax.random.PRNGKey(0)
    k1, k2 = jax.random.split(key)
    seq_out = jax.random.normal(k1, (B, S, H), dtype=jnp.float32)
    target_vec = jax.random.normal(k2, (B, T, H), dtype=jnp.float32)
    # Mix of lengths < T, between T and S, and == S (exercises both masks and
    # the batch-padding path, since B=10 is padded up to the batch block).
    seq_length = jnp.array([3, 16, 7, 12, 1, 16, 5, 9, 10, 2], dtype=jnp.int32)
    target_length = jnp.full((B,), T, dtype=jnp.int32)

    rep, a_ts = aoa_attention(seq_out, seq_length, target_vec, target_length)
    jax.block_until_ready((rep, a_ts))

    rep_ref, a_ts_ref = aoa_attention_ref(seq_out, seq_length, target_vec,
                                          target_length)
    # Tolerances allow for the approximate EUP reciprocal used in the kernel's
    # softmax / length normalization and for MXU precision / contraction-order
    # differences vs. the XLA reference.
    np.testing.assert_allclose(np.asarray(a_ts), np.asarray(a_ts_ref),
                               rtol=1e-2, atol=1e-5)
    np.testing.assert_allclose(np.asarray(rep), np.asarray(rep_ref),
                               rtol=2e-2, atol=2e-3)

    print("KERNEL_OK")
</pallas_src>

<mosaic_0001>
module attributes {stable_mosaic.version = 11 : i64} {
  func.func @_aoa_kernel(%arg0: i32, %arg1: memref<16x1x1xi32, #tpu.memory_space<vmem>>, %arg2: memref<16x16x32xf32, #tpu.memory_space<vmem>>, %arg3: memref<16x8x32xf32, #tpu.memory_space<vmem>>, %arg4: memref<16x1x32xf32, #tpu.memory_space<vmem>>, %arg5: memref<16x8x16xf32, #tpu.memory_space<vmem>>) attributes {dimension_semantics = [#tpu.dimension_semantics<parallel>], iteration_bounds = array<i64: 1>, scalar_prefetch = 0 : i64, scratch_operands = 0 : i64, tpu.core_type = #tpu.core_type<tc>, window_params = [{transform_indices = @transform_0, window_bounds = array<i64: 16, 1, 1>}, {transform_indices = @transform_1, window_bounds = array<i64: 16, 16, 32>}, {transform_indices = @transform_2, window_bounds = array<i64: 16, 8, 32>}, {transform_indices = @transform_3, window_bounds = array<i64: 16, 1, 32>}, {transform_indices = @transform_4, window_bounds = array<i64: 16, 8, 16>}]} {
    %c0 = arith.constant 0 : index
    %c0_0 = arith.constant 0 : index
    %c0_1 = arith.constant 0 : index
    %0 = vector.load %arg2[%c0, %c0_0, %c0_1] : memref<16x16x32xf32, #tpu.memory_space<vmem>>, vector<16x16x32xf32>
    %c0_2 = arith.constant 0 : index
    %c0_3 = arith.constant 0 : index
    %c0_4 = arith.constant 0 : index
    %1 = vector.load %arg3[%c0_2, %c0_3, %c0_4] : memref<16x8x32xf32, #tpu.memory_space<vmem>>, vector<16x8x32xf32>
    %c0_5 = arith.constant 0 : index
    %c0_6 = arith.constant 0 : index
    %c0_7 = arith.constant 0 : index
    %2 = vector.load %arg1[%c0_5, %c0_6, %c0_7] : memref<16x1x1xi32, #tpu.memory_space<vmem>>, vector<16x1x1xi32>
    "tpu.trace_start"() <{level = 10 : i32, message = "bth,bsh->bts"}> : () -> ()
    %cst = arith.constant dense<0.000000e+00> : vector<16x8x16xf32>
    %3 = tpu.matmul %1, %0, %cst {dimension_numbers = #tpu.dot_dimension_numbers<[2], [2], [1], [1], [0, 0, 0, 1, 1, 1], [0], [0]>} : vector<16x8x32xf32>, vector<16x16x32xf32>, vector<16x8x16xf32> -> vector<16x8x16xf32>
    "tpu.trace_stop"() : () -> ()
    %4 = tpu.iota {dimensions = array<i32: 2>} : vector<1x1x16xi32>
    %5 = vector.broadcast %4 : vector<1x1x16xi32> to vector<16x1x16xi32>
    %6 = vector.broadcast %2 : vector<16x1x1xi32> to vector<16x1x16xi32>
    %7 = arith.cmpi slt, %5, %6 : vector<16x1x16xi32>
    %cst_8 = arith.constant -1.000000e+04 : f32
    %8 = vector.shape_cast %7 : vector<16x1x16xi1> to vector<16x1x16xi1>
    %9 = vector.broadcast %8 : vector<16x1x16xi1> to vector<16x8x16xi1>
    %10 = vector.broadcast %cst_8 : f32 to vector<16x8x16xf32>
    %11 = arith.select %9, %3, %10 : vector<16x8x16xi1>, vector<16x8x16xf32>
    %cst_9 = arith.constant dense<0xFF800000> : vector<16x8xf32>
    %12 = vector.multi_reduction <maximumf>, %11, %cst_9 [2] : vector<16x8x16xf32> to vector<16x8xf32>
    %13 = vector.shape_cast %12 : vector<16x8xf32> to vector<16x8x1xf32>
    %14 = vector.broadcast %13 : vector<16x8x1xf32> to vector<16x8x16xf32>
    %15 = arith.subf %11, %14 : vector<16x8x16xf32>
    %16 = math.exp %15 : vector<16x8x16xf32>
    %cst_10 = arith.constant dense<0.000000e+00> : vector<16x8xf32>
    %17 = vector.multi_reduction <add>, %16, %cst_10 [2] : vector<16x8x16xf32> to vector<16x8xf32>
    %18 = vector.shape_cast %17 : vector<16x8xf32> to vector<16x8x1xf32>
    %19 = tpu.reciprocal %18 {approx = true} : vector<16x8x1xf32> -> vector<16x8x1xf32>
    %20 = vector.broadcast %19 : vector<16x8x1xf32> to vector<16x8x16xf32>
    %21 = arith.mulf %16, %20 : vector<16x8x16xf32>
    %c0_11 = arith.constant 0 : index
    %c0_12 = arith.constant 0 : index
    %c0_13 = arith.constant 0 : index
    %22 = vector.load %arg5[%c0_11, %c0_12, %c0_13] : memref<16x8x16xf32, #tpu.memory_space<vmem>>, vector<16x8x16xf32>
    tpu.vector_store %arg5[%c0_11, %c0_12, %c0_13], %21 {strides = array<i32>} : memref<16x8x16xf32, #tpu.memory_space<vmem>>, vector<16x8x16xf32>,
    %23 = tpu.iota {dimensions = array<i32: 1>} : vector<1x8x1xi32>
    %24 = vector.broadcast %23 : vector<1x8x1xi32> to vector<16x8x1xi32>
    %25 = vector.broadcast %2 : vector<16x1x1xi32> to vector<16x8x1xi32>
    %26 = arith.cmpi slt, %24, %25 : vector<16x8x1xi32>
    %cst_14 = arith.constant -1.000000e+04 : f32
    %27 = vector.shape_cast %26 : vector<16x8x1xi1> to vector<16x8x1xi1>
    %28 = vector.broadcast %27 : vector<16x8x1xi1> to vector<16x8x16xi1>
    %29 = vector.broadcast %cst_14 : f32 to vector<16x8x16xf32>
    %30 = arith.select %28, %11, %29 : vector<16x8x16xi1>, vector<16x8x16xf32>
    %cst_15 = arith.constant dense<0xFF800000> : vector<16x16xf32>
    %31 = vector.multi_reduction <maximumf>, %30, %cst_15 [1] : vector<16x8x16xf32> to vector<16x16xf32>
    %32 = vector.shape_cast %31 : vector<16x16xf32> to vector<16x1x16xf32>
    %33 = vector.broadcast %32 : vector<16x1x16xf32> to vector<16x8x16xf32>
    %34 = arith.subf %30, %33 : vector<16x8x16xf32>
    %35 = math.exp %34 : vector<16x8x16xf32>
    %cst_16 = arith.constant dense<0.000000e+00> : vector<16x16xf32>
    %36 = vector.multi_reduction <add>, %35, %cst_16 [1] : vector<16x8x16xf32> to vector<16x16xf32>
    %37 = vector.shape_cast %36 : vector<16x16xf32> to vector<16x1x16xf32>
    %38 = tpu.reciprocal %37 {approx = true} : vector<16x1x16xf32> -> vector<16x1x16xf32>
    %39 = arith.sitofp %2 : vector<16x1x1xi32> to vector<16x1x1xf32>
    %40 = tpu.reciprocal %39 {approx = true} : vector<16x1x1xf32> -> vector<16x1x1xf32>
    %41 = vector.broadcast %38 : vector<16x1x16xf32> to vector<16x8x16xf32>
    %42 = arith.mulf %35, %41 : vector<16x8x16xf32>
    %cst_17 = arith.constant dense<0.000000e+00> : vector<16x8xf32>
    %43 = vector.multi_reduction <add>, %42, %cst_17 [2] : vector<16x8x16xf32> to vector<16x8xf32>
    %44 = vector.shape_cast %43 : vector<16x8xf32> to vector<16x8x1xf32>
    %45 = vector.broadcast %40 : vector<16x1x1xf32> to vector<16x8x1xf32>
    %46 = arith.mulf %44, %45 : vector<16x8x1xf32>
    "tpu.trace_start"() <{level = 10 : i32, message = "bts,bsh->bth"}> : () -> ()
    %cst_18 = arith.constant dense<0.000000e+00> : vector<16x8x32xf32>
    %47 = tpu.matmul %21, %0, %cst_18 {dimension_numbers = #tpu.dot_dimension_numbers<[2], [1], [1], [2], [0, 0, 0, 1, 1, 2], [0], [0]>} : vector<16x8x16xf32>, vector<16x16x32xf32>, vector<16x8x32xf32> -> vector<16x8x32xf32>
    "tpu.trace_stop"() : () -> ()
    %48 = vector.broadcast %46 : vector<16x8x1xf32> to vector<16x8x32xf32>
    %49 = arith.mulf %47, %48 : vector<16x8x32xf32>
    %cst_19 = arith.constant dense<0.000000e+00> : vector<16x32xf32>
    %50 = vector.multi_reduction <add>, %49, %cst_19 [1] : vector<16x8x32xf32> to vector<16x32xf32>
    %51 = vector.shape_cast %50 : vector<16x32xf32> to vector<16x1x32xf32>
    %c0_20 = arith.constant 0 : index
    %c0_21 = arith.constant 0 : index
    %c0_22 = arith.constant 0 : index
    %52 = vector.load %arg4[%c0_20, %c0_21, %c0_22] : memref<16x1x32xf32, #tpu.memory_space<vmem>>, vector<16x1x32xf32>
    tpu.vector_store %arg4[%c0_20, %c0_21, %c0_22], %51 {strides = array<i32>} : memref<16x1x32xf32, #tpu.memory_space<vmem>>, vector<16x1x32xf32>,
    return
  }
  func.func @transform_0(%arg0: i32) -> (i32, i32, i32) {
    %c0_i32 = arith.constant 0 : i32
    %c0_i32_0 = arith.constant 0 : i32
    %c0_i32_1 = arith.constant 0 : i32
    return %arg0, %c0_i32, %c0_i32_0 : i32, i32, i32
  }
  func.func @transform_1(%arg0: i32) -> (i32, i32, i32) {
    %c0_i32 = arith.constant 0 : i32
    %c0_i32_0 = arith.constant 0 : i32
    %c0_i32_1 = arith.constant 0 : i32
    return %arg0, %c0_i32, %c0_i32_0 : i32, i32, i32
  }
  func.func @transform_2(%arg0: i32) -> (i32, i32, i32) {
    %c0_i32 = arith.constant 0 : i32
    %c0_i32_0 = arith.constant 0 : i32
    %c0_i32_1 = arith.constant 0 : i32
    return %arg0, %c0_i32, %c0_i32_0 : i32, i32, i32
  }
  func.func @transform_3(%arg0: i32) -> (i32, i32, i32) {
    %c0_i32 = arith.constant 0 : i32
    %c0_i32_0 = arith.constant 0 : i32
    %c0_i32_1 = arith.constant 0 : i32
    return %arg0, %c0_i32, %c0_i32_0 : i32, i32, i32
  }
  func.func @transform_4(%arg0: i32) -> (i32, i32, i32) {
    %c0_i32 = arith.constant 0 : i32
    %c0_i32_0 = arith.constant 0 : i32
    %c0_i32_1 = arith.constant 0 : i32
    return %arg0, %c0_i32, %c0_i32_0 : i32, i32, i32
  }
}

</mosaic_0001>

<bundles_post_ra>
// kernel: aoa_attention.1
= control target key start
LH: loop header
LB: loop body
LE: loop exit
PB: predicated region body
PF: predicated region fallthrough
CT: control target
= control target key end

     0   :  { %vm80_vm0 = vcmask 261120   ;;  %v5644_v0 = vmov 0.0|0.0   ;;  %vm4470_vm2 = vmmov 0   ;;  %v5646_v7 = vmov 0.0   ;;  %s5639_s1 = inlined_call_operand.vmem [shape: f32[16,16,32], index: 1, kind: input, shape index: {}]   ;;  %s5640_s2 = inlined_call_operand.vmem [shape: f32[16,8,32], index: 2, kind: input, shape index: {}]   ;;  %s5641_s0 = inlined_call_operand.vmem [shape: s32[16,1,1], index: 0, kind: input, shape index: {}]   ;;  %s5642_s4 = inlined_call_operand.vmem [shape: f32[16,8,16], index: 4, kind: output, shape index: {1}]   ;;  %s5643_s3 = inlined_call_operand.vmem [shape: f32[16,1,32], index: 3, kind: output, shape index: {0}]  }
   0x1   :  { %4175 = vmatprep.subr.bf16.mxu0 %v5644_v0  ;;  %4179 = vmatprep.subr.bf16.mxu1 %v5644_v0  ;;  %v16_v1 = vld [vmem:[%s5639_s1] sm:$0xff]  ;;  %v17_v2 = vld [vmem:[%s5639_s1 + $0x8] sm:$0xff]  ;;  %vm4508_vm1 = vmpackc.low %vm80_vm0, %vm80_vm0  ;;  %v5648_v9 = vmov 0   ;;  %v1345_v53 = vlaneseq  ;;  %vm1523_vm11 = vcmask 130048  }
   0x2   :  { %v4512_v4 = vpack.c.bf16 %v17_v2, %v16_v1  ;;  %v18_v5 = vld [vmem:[%s5639_s1 + $0x10] sm:$0xff]  ;;  %v19_v6 = vld [vmem:[%s5639_s1 + $0x18] sm:$0xff]  ;;  %3955 = vmatprep.mubr.msk.f32.mxu0 %vm4470_vm2, %v5646_v7  ;;  %3962 = vmatprep.mubr.msk.f32.mxu1 %vm4470_vm2, %v5646_v7  ;;  %v20_v10 = vld [vmem:[%s5639_s1 + $0x20] sm:$0xff] }
   0x3   :  { %v4524_v8 = vpack.c.bf16 %v19_v6, %v18_v5  ;;  %4292 = vset.pattern.permute.xlu1 %v5648_v9  ;;  %4291 = vset.pattern.permute.xlu0 %v5648_v9  ;;  %v21_v11 = vld [vmem:[%s5639_s1 + $0x28] sm:$0xff]  ;;  %v22_v12 = vld [vmem:[%s5639_s1 + $0x30] sm:$0xff]  ;;  %v23_v13 = vld [vmem:[%s5639_s1 + $0x38] sm:$0xff]  ;;  %v4768_v62 = vshrl.u32 %v1345_v53, 7 }
   0x4   :  { %4178 = vmatpush3.bf16.xpose.msk.msra.mxu0 %vm4508_vm1, %v4512_v4  ;;  %v48_v14 = vld [vmem:[%s5640_s2] sm:$0xff]  ;;  %v4551_v15 = vpack.c.bf16 %v21_v11, %v20_v10  ;;  %v49_v16 = vld [vmem:[%s5640_s2 + $0x8] sm:$0xff]  ;;  %v4556_v17 = vpack.c.bf16 %v23_v13, %v22_v12  ;;  %v26_v20 = vld [vmem:[%s5639_s1 + $0x50] sm:$0xff] }
   0x5   :  { %4182 = vmatpush3.bf16.xpose.msk.msra.mxu1 %vm4508_vm1, %v4524_v8  ;;  %4183 = vmatprep.subr.bf16.mxu0 %v5644_v0  ;;  %v24_v18 = vld [vmem:[%s5639_s1 + $0x40] sm:$0xff]  ;;  %v25_v19 = vld [vmem:[%s5639_s1 + $0x48] sm:$0xff]  ;;  %v27_v21 = vld [vmem:[%s5639_s1 + $0x58] sm:$0xff]  ;;  %v4793_v5 = vsub.s32 0, %v4768_v62 }
   0x6   :  { %4187 = vmatprep.subr.bf16.mxu1 %v5644_v0  ;;  %v50_v22 = vld [vmem:[%s5640_s2 + $0x10] sm:$0xff]  ;;  %v4587_v23 = vpack.c.bf16 %v25_v19, %v24_v18  ;;  %v4592_v24 = vld [vmem:[%s5641_s0 + $0x2] sm:$0x1]  ;;  %v51_v25 = vld [vmem:[%s5640_s2 + $0x18] sm:$0xff]  ;;  %v4597_v26 = vpack.c.bf16 %v27_v21, %v26_v20 }
   0x7   :  { %1362 = vperm.xlu1 %4292, %v4592_v24   ;;  %v4603_v27 = vld [vmem:[%s5641_s0] sm:$0x1]  ;;  %v4614_v28 = vld [vmem:[%s5641_s0 + $0x3] sm:$0x1]  ;;  %v29_v30 = vld [vmem:[%s5639_s1 + $0x68] sm:$0xff]  ;;  %5671 = vst [vmem:[#allocation4_spill] sm:$0xff] %v4793_v5 }
   0x8   :  { %1348 = vperm.xlu0 %4291, %v4603_v27   ;;  %v28_v29 = vld [vmem:[%s5639_s1 + $0x60] sm:$0xff]  ;;  %v30_v32 = vld [vmem:[%s5639_s1 + $0x70] sm:$0xff]  ;;  %v31_v33 = vld [vmem:[%s5639_s1 + $0x78] sm:$0xff]  ;;  %v1721_v19 = vrot.slane %v4603_v27, %v4793_v5  ;;  %v1729_v27 = vrot.slane %v4592_v24, %v4793_v5 }
   0x9   :  { %v4630_v31 = vld [vmem:[%s5641_s0 + $0x1] sm:$0x1]  ;;  %v4646_v35 = vpack.c.bf16 %v29_v30, %v28_v29  ;;  %v4652_v36 = vld [vmem:[%s5641_s0 + $0x5] sm:$0x1]  ;;  %v53_v37 = vld [vmem:[%s5640_s2 + $0x28] sm:$0xff]  ;;  %v4657_v38 = vpack.c.bf16 %v31_v33, %v30_v32 }
   0xa   :  { %v52_v34 = vld [vmem:[%s5640_s2 + $0x20] sm:$0xff]  ;;  %v33_v41 = vld [vmem:[%s5639_s1 + $0x88] sm:$0xff]  ;;  %v34_v43 = vld [vmem:[%s5639_s1 + $0x90] sm:$0xff]  ;;  %v1725_v20 = vrot.slane %v4630_v31, %v4793_v5  ;;  %vm1782_vm3 = vcmp.lt.s32.totalorder %v4768_v62, %v1721_v19  ;;  %vm1784_vm5 = vcmp.lt.s32.totalorder %v4768_v62, %v1729_v27 }
   0xb   :  { %3956 = vmatmul.mubr.msk.f32.vlgmr.msra.gmra.mrb[0].mxu0 %vm80_vm0, %v48_v14  ;;  %1369 = vperm.xlu1 %4292, %v4614_v28   ;;  %v4668_v39 = vld [vmem:[%s5641_s0 + $0x4] sm:$0x1]  ;;  %v4684_v42 = vld [vmem:[%s5641_s0 + $0x7] sm:$0x1]  ;;  %v35_v44 = vld [vmem:[%s5639_s1 + $0x98] sm:$0xff] }
   0xc   :  { %3963 = vmatmul.mubr.msk.f32.vlgmr.msra.gmra.mrb[0].mxu1 %vm80_vm0, %v49_v16  ;;  %4186 = vmatpush3.bf16.xpose.msk.msra.mxu0 %vm4508_vm1, %v4551_v15  ;;  %v32_v40 = vld [vmem:[%s5639_s1 + $0x80] sm:$0xff]  ;;  %v54_v45 = vld [vmem:[%s5640_s2 + $0x30] sm:$0xff]  ;;  %v55_v48 = vld [vmem:[%s5640_s2 + $0x38] sm:$0xff]  ;;  %v4711_v49 = vpack.c.bf16 %v35_v44, %v34_v43  ;;  %v1737_v33 = vrot.slane %v4668_v39, %v4793_v5  ;;  %vm1783_vm4 = vcmp.lt.s32.totalorder %v4768_v62, %v1725_v20  ;;  %v1800_v43 = vsel %vm1784_vm5, 1, %v5648_v9 }
   0xd   :  { %4190 = vmatpush3.bf16.xpose.msk.msra.mxu1 %vm4508_vm1, %v4556_v17  ;;  %3969 = vmatprep.mubr.msk.f32.mxu0 %vm4470_vm2, %v5646_v7  ;;  %v4700_v46 = vpack.c.bf16 %v33_v41, %v32_v40  ;;  %v4706_v47 = vld [vmem:[%s5641_s0 + $0x6] sm:$0x1]  ;;  %v4722_v50 = vld [vmem:[%s5641_s0 + $0x9] sm:$0x1]  ;;  %v4738_v54 = vld [vmem:[%s5641_s0 + $0x8] sm:$0x1]  ;;  %v1733_v41 = vrot.slane %v4614_v28, %v4793_v5  ;;  %v1741_v28 = vrot.slane %v4652_v36, %v4793_v5 }
   0xe   :  { %3976 = vmatprep.mubr.msk.f32.mxu1 %vm4470_vm2, %v5646_v7  ;;  %4191 = vmatprep.subr.bf16.mxu0 %v5644_v0  ;;  %v36_v51 = vld [vmem:[%s5639_s1 + $0xa0] sm:$0xff]  ;;  %v37_v52 = vld [vmem:[%s5639_s1 + $0xa8] sm:$0xff]  ;;  %v38_v55 = vld [vmem:[%s5639_s1 + $0xb0] sm:$0xff]  ;;  %vm1786_vm6 = vcmp.lt.s32.totalorder %v4768_v62, %v1737_v33 }
   0xf   :  { %4195 = vmatprep.subr.bf16.mxu1 %v5644_v0  ;;  %1355 = vperm.xlu0 %4291, %v4630_v31   ;;  %v39_v56 = vld [vmem:[%s5639_s1 + $0xb8] sm:$0xff]  ;;  %v56_v57 = vld [vmem:[%s5640_s2 + $0x40] sm:$0xff]  ;;  %v4754_v58 = vpack.c.bf16 %v37_v52, %v36_v51  ;;  %v4760_v59 = vld [vmem:[%s5641_s0 + $0xb] sm:$0x1]  ;;  %vm1785_vm7 = vcmp.lt.s32.totalorder %v4768_v62, %v1733_v41  ;;  %v1802_v44 = vsel %vm1786_vm6, 1, %v5648_v9  ;;  %vm1787_vm8 = vcmp.lt.s32.totalorder %v4768_v62, %v1741_v28 }
  0x10   :  { %1383 = vperm.xlu1 %4292, %v4652_v36   ;;  %v57_v60 = vld [vmem:[%s5640_s2 + $0x48] sm:$0xff]  ;;  %v4765_v61 = vpack.c.bf16 %v39_v56, %v38_v55  ;;  %v40_v1 = vld [vmem:[%s5639_s1 + $0xc0] sm:$0xff]  ;;  %v42_v10 = vld [vmem:[%s5639_s1 + $0xd0] sm:$0xff]  ;;  %v4932_v56 = vand.u32 127, %v1345_v53 }
  0x11   :  { %5669 = vst [vmem:[#allocation2_spill] sm:$0xff] %v4754_v58  ;;  %v4779_v63 = vld [vmem:[%s5641_s0 + $0xa] sm:$0x1]  ;;  %v4798_v6 = vld [vmem:[%s5641_s0 + $0xd] sm:$0x1]  ;;  %v43_v11 = vld [vmem:[%s5639_s1 + $0xd8] sm:$0xff] }
  0x12   :  { %5670 = vst [vmem:[#allocation3_spill] sm:$0xff] %v4765_v61  ;;  %v41_v2 = vld [vmem:[%s5639_s1 + $0xc8] sm:$0xff]  ;;  %v58_v12 = vld [vmem:[%s5640_s2 + $0x50] sm:$0xff]  ;;  %v59_v16 = vld [vmem:[%s5640_s2 + $0x58] sm:$0xff]  ;;  %v4825_v18 = vpack.c.bf16 %v43_v11, %v42_v10 }
  0x13   :  { %3970 = vmatmul.mubr.msk.f32.vlgmr.msra.gmra.mrb[2].mxu0 %vm80_vm0, %v50_v22  ;;  %1376 = vperm.xlu0 %4291, %v4668_v39   ;;  %v4814_v13 = vpack.c.bf16 %v41_v2, %v40_v1  ;;  %v4820_v14 = vld [vmem:[%s5641_s0 + $0xc] sm:$0x1]  ;;  %v4840_v21 = vld [vmem:[%s5641_s0 + $0xf] sm:$0x1]  ;;  %v44_v22 = vld [vmem:[%s5639_s1 + $0xe0] sm:$0xff]  ;;  %v1799_v39 = vsel %vm1783_vm4, 1, %v5648_v9 }
  0x14   :  { %3977 = vmatmul.mubr.msk.f32.vlgmr.msra.gmra.mrb[2].mxu1 %vm80_vm0, %v51_v25  ;;  %4194 = vmatpush3.bf16.xpose.msk.msra.mxu0 %vm4508_vm1, %v4587_v23  ;;  %5673 = vst [vmem:[#allocation6_spill] sm:$0xff] %v4825_v18  ;;  %v45_v25 = vld [vmem:[%s5639_s1 + $0xe8] sm:$0xff]  ;;  %v46_v30 = vld [vmem:[%s5639_s1 + $0xf0] sm:$0xff]  ;;  %v47_v24 = vld [vmem:[%s5639_s1 + $0xf8] sm:$0xff] }
  0x15   :  { %4198 = vmatpush3.bf16.xpose.msk.msra.mxu1 %vm4508_vm1, %v4597_v26  ;;  %3983 = vmatprep.mubr.msk.f32.mxu0 %vm4470_vm2, %v5646_v7  ;;  %5672 = vst [vmem:[#allocation5_spill] sm:$0xff] %v4814_v13  ;;  %v4858_v29 = vld [vmem:[%s5641_s0 + $0xe] sm:$0x1]  ;;  %v60_v31 = vld [vmem:[%s5640_s2 + $0x60] sm:$0xff]  ;;  %v4875_v32 = vpack.c.bf16 %v45_v25, %v44_v22  ;;  %v4885_v40 = vpack.c.bf16 %v47_v24, %v46_v30  ;;  %v62_v3 = vld [vmem:[%s5640_s2 + $0x70] sm:$0xff] }
  0x16   :  { %3990 = vmatprep.mubr.msk.f32.mxu1 %vm4470_vm2, %v5646_v7  ;;  %4199 = vmatprep.subr.bf16.mxu0 %v5644_v0  ;;  %v63_v36 = vld [vmem:[%s5640_s2 + $0x78] sm:$0xff] }
  0x17   :  { %4203 = vmatprep.subr.bf16.mxu1 %v5644_v0  ;;  %1397 = vperm.xlu1 %4292, %v4684_v42   ;;  %5674 = vst [vmem:[#allocation7_spill] sm:$0xff] %v4875_v32  ;;  %5675 = vst [vmem:[#allocation8_spill] sm:$0xff] %v4885_v40 }
  0x18   :  { %1390 = vperm.xlu0 %4291, %v4706_v47  }
  0x1b   :  { %3984 = vmatmul.mubr.msk.f32.vlgmr.msra.gmra.mrb[4].mxu0 %vm80_vm0, %v52_v34  ;;  %1411 = vperm.xlu1 %4292, %v4722_v50   ;;  %v1798_v34 = vsel %vm1782_vm3, 1, %v5648_v9 }
  0x1c   :  { %3991 = vmatmul.mubr.msk.f32.vlgmr.msra.gmra.mrb[4].mxu1 %vm80_vm0, %v53_v37  ;;  %4202 = vmatpush3.bf16.xpose.msk.msra.mxu0 %vm4508_vm1, %v4646_v35  ;;  %v61_v37 = vld [vmem:[%s5640_s2 + $0x68] sm:$0xff] }
  0x1d   :  { %4206 = vmatpush3.bf16.xpose.msk.msra.mxu1 %vm4508_vm1, %v4657_v38  ;;  %3997 = vmatprep.mubr.msk.f32.mxu0 %vm4470_vm2, %v5646_v7 }
  0x1e   :  { %4004 = vmatprep.mubr.msk.f32.mxu1 %vm4470_vm2, %v5646_v7  ;;  %4207 = vmatprep.subr.bf16.mxu0 %v5644_v0 }
  0x1f   :  { %4211 = vmatprep.subr.bf16.mxu1 %v5644_v0  ;;  %1404 = vperm.xlu0 %4291, %v4738_v54  }
  0x20   :  { %1425 = vperm.xlu1 %4292, %v4760_v59  }
  0x23   :  { %3998 = vmatmul.mubr.msk.f32.vlgmr.msra.gmra.mrb[6].mxu0 %vm80_vm0, %v54_v45  ;;  %1418 = vperm.xlu0 %4291, %v4779_v63   ;;  %v1801_v45 = vsel %vm1785_vm7, 1, %v5648_v9 }
  0x24   :  { %4005 = vmatmul.mubr.msk.f32.vlgmr.msra.gmra.mrb[6].mxu1 %vm80_vm0, %v55_v48  ;;  %4210 = vmatpush3.bf16.xpose.msk.msra.mxu0 %vm4508_vm1, %v4700_v46  ;;  %v1803_v48 = vsel %vm1787_vm8, 1, %v5648_v9 }
  0x25   :  { %4214 = vmatpush3.bf16.xpose.msk.msra.mxu1 %vm4508_vm1, %v4711_v49  ;;  %4011 = vmatprep.mubr.msk.f32.mxu0 %vm4470_vm2, %v5646_v7 }
  0x26   :  { %4018 = vmatprep.mubr.msk.f32.mxu1 %vm4470_vm2, %v5646_v7  ;;  %4215 = vmatprep.subr.bf16.mxu0 %v5644_v0 }
  0x27   :  { %4219 = vmatprep.subr.bf16.mxu1 %v5644_v0  ;;  %1439 = vperm.xlu1 %4292, %v4798_v6  }
  0x28   :  { %1432 = vperm.xlu0 %4291, %v4820_v14  }
  0x2b   :  { %4012 = vmatmul.mubr.msk.f32.vlgmr.msra.gmra.mrb[8].mxu0 %vm80_vm0, %v56_v57  ;;  %1453 = vperm.xlu1 %4292, %v4840_v21  }
  0x2c   :  { %4019 = vmatmul.mubr.msk.f32.vlgmr.msra.gmra.mrb[8].mxu1 %vm80_vm0, %v57_v60  ;;  %4218 = vmatpush3.bf16.xpose.msk.msra.mxu0 %vm4508_vm1, %v4754_v58 }
  0x2d   :  { %4222 = vmatpush3.bf16.xpose.msk.msra.mxu1 %vm4508_vm1, %v4765_v61  ;;  %4025 = vmatprep.mubr.msk.f32.mxu0 %vm4470_vm2, %v5646_v7 }
  0x2e   :  { %4032 = vmatprep.mubr.msk.f32.mxu1 %vm4470_vm2, %v5646_v7  ;;  %4223 = vmatprep.subr.bf16.mxu0 %v5644_v0 }
  0x2f   :  { %4227 = vmatprep.subr.bf16.mxu1 %v5644_v0  ;;  %1446 = vperm.xlu0 %4291, %v4858_v29  }
  0x30   :  { %1815 = vperm.xlu1 %4292, %v1798_v34  }
  0x33   :  { %4026 = vmatmul.mubr.msk.f32.vlgmr.msra.gmra.mrb[10].mxu0 %vm80_vm0, %v58_v12  ;;  %1818 = vperm.xlu0 %4291, %v1799_v39  }
  0x34   :  { %4033 = vmatmul.mubr.msk.f32.vlgmr.msra.gmra.mrb[10].mxu1 %vm80_vm0, %v59_v16  ;;  %4226 = vmatpush3.bf16.xpose.msk.msra.mxu0 %vm4508_vm1, %v4814_v13 }
  0x35   :  { %4230 = vmatpush3.bf16.xpose.msk.msra.mxu1 %vm4508_vm1, %v4825_v18  ;;  %4039 = vmatprep.mubr.msk.f32.mxu0 %vm4470_vm2, %v5646_v7 }
  0x36   :  { %4046 = vmatprep.mubr.msk.f32.mxu1 %vm4470_vm2, %v5646_v7  ;;  %4231 = vmatprep.subr.bf16.mxu0 %v5644_v0 }
  0x37   :  { %4235 = vmatprep.subr.bf16.mxu1 %v5644_v0  ;;  %1821 = vperm.xlu1 %4292, %v1800_v43  }
  0x38   :  { %1827 = vperm.xlu0 %4291, %v1802_v44  }
  0x3b   :  { %4040 = vmatmul.mubr.msk.f32.vlgmr.msra.gmra.mrb[12].mxu0 %vm80_vm0, %v60_v31  ;;  %1824 = vperm.xlu1 %4292, %v1801_v45  }
  0x3c   :  { %4047 = vmatmul.mubr.msk.f32.vlgmr.msra.gmra.mrb[12].mxu1 %vm80_vm0, %v61_v37  ;;  %4234 = vmatpush3.bf16.xpose.msk.msra.mxu0 %vm4508_vm1, %v4875_v32 }
  0x3d   :  { %4238 = vmatpush3.bf16.xpose.msk.msra.mxu1 %vm4508_vm1, %v4885_v40  ;;  %4053 = vmatprep.mubr.msk.f32.mxu0 %vm4470_vm2, %v5646_v7 }
  0x3e   :  { %4060 = vmatprep.mubr.msk.f32.mxu1 %vm4470_vm2, %v5646_v7  ;;  %4239 = vmatprep.subr.bf16.mxu0 %v5644_v0 }
  0x3f   :  { %4242 = vmatprep.subr.bf16.mxu1 %v5644_v0  ;;  %1830 = vperm.xlu1 %4292, %v1803_v48  }
  0x43   :  { %4054 = vmatmul.mubr.msk.f32.vlgmr.msra.gmra.mrb[14].mxu0 %vm80_vm0, %v62_v3 }
  0x44   :  { %4061 = vmatmul.mubr.msk.f32.vlgmr.msra.gmra.mrb[14].mxu1 %vm80_vm0, %v63_v36  ;;  %4241 = vmatpush3.bf16.msra.mxu0 %v4512_v4 }
  0x45   :  { %4244 = vmatpush3.bf16.msra.mxu1 %v4524_v8  ;;  %4067 = vmatprep.mubr.msk.f32.mxu0 %vm4470_vm2, %v5646_v7 }
  0x46   :  { %4074 = vmatprep.mubr.msk.f32.mxu1 %vm4470_vm2, %v5646_v7  ;;  %4245 = vmatprep.subr.bf16.mxu0 %v5644_v0 }
  0x47   :  { %4248 = vmatprep.subr.bf16.mxu1 %v5644_v0 }
  0x86   :  { %v1363_v8 = vpop.permute.xlu1 %1362 }
  0x87   :  { %v1349_v51 = vpop.permute.xlu0 %1348  ;;  %v1367_v10 = vrot.slane %v1363_v8, %v4793_v5 }
  0x88   :  { %v1353_v52 = vrot.slane %v1349_v51, %v4793_v5 }
  0x89   :  { %vm1461_vm12 = vcmp.lt.s32.totalorder %v4932_v56, %v1367_v10 }
  0x8a   :  { %vm1459_vm9 = vcmp.lt.s32.totalorder %v4932_v56, %v1353_v52  ;;  %v1370_v11 = vpop.permute.xlu1 %1369 }
  0x8b   :  { %v1374_v20 = vrot.slane %v1370_v11, %v4793_v5 }
  0x8d   :  { %vm1462_vm13 = vcmp.lt.s32.totalorder %v4932_v56, %v1374_v20 }
  0x8e   :  { %v1356_v55 = vpop.permute.xlu0 %1355 }
  0x8f   :  { %v1360_v4 = vrot.slane %v1356_v55, %v4793_v5  ;;  %v1384_v22 = vpop.permute.xlu1 %1383 }
  0x90   :  { %v1388_v37 = vrot.slane %v1384_v22, %v4793_v5 }
  0x91   :  { %vm1460_vm10 = vcmp.lt.s32.totalorder %v4932_v56, %v1360_v4 }
  0x92   :  { %v1377_v31 = vpop.permute.xlu0 %1376  ;;  %vm1464_vm14 = vcmp.lt.s32.totalorder %v4932_v56, %v1388_v37 }
  0x93   :  { %v1381_v39 = vrot.slane %v1377_v31, %v4793_v5 }
  0x95   :  { %vm1463_vm15 = vcmp.lt.s32.totalorder %v4932_v56, %v1381_v39 }
  0x96   :  { %v1398_v36 = vpop.permute.xlu1 %1397 }
  0x97   :  { %v1391_v28 = vpop.permute.xlu0 %1390  ;;  %v1402_v55 = vrot.slane %v1398_v36, %v4793_v5 }
  0x98   :  { %v1395_v48 = vrot.slane %v1391_v28, %v4793_v5 }
  0x99   :  { %vm1466_vm3 = vcmp.lt.s32.totalorder %v4932_v56, %v1402_v55 }
  0x9a   :  { %vm1465_vm1 = vcmp.lt.s32.totalorder %v4932_v56, %v1395_v48 }
  0x9e   :  { %v1405_v20 = vpop.permute.xlu0 %1404 }
  0xde   :  { %v156_v57 = vpop.f32.mrb[0].mxu0 }
  0xdf   :  { %v4937_v60 = vsel %vm1459_vm9, %v156_v57, -10000.0  ;;  %v235_v1 = vpop.f32.mrb[0].mxu1  ;;  %v3957_v2 = vpop.f32.mrb[1].mxu0 }
  0xe0   :  { %v4940_v12 = vsel %vm1460_vm10, %v235_v1, -10000.0  ;;  %v3964_v53 = vpop.f32.mrb[1].mxu1  ;;  %v1524_v16 = vsel %vm1523_vm11, %v4937_v60, -inf }
  0xe1   :  { %1525 = vmax.xlane.f32.xlu0 %v1524_v16  ;;  %v1527_v19 = vsel %vm1523_vm11, %v4940_v12, -inf }
  0xe2   :  { %1528 = vmax.xlane.f32.xlu1 %v1527_v19 }
  0xe6   :  { %v314_v25 = vpop.f32.mrb[2].mxu0 }
  0xe7   :  { %v4949_v27 = vsel %vm1461_vm12, %v314_v25, -10000.0  ;;  %v393_v30 = vpop.f32.mrb[2].mxu1  ;;  %v3971_v24 = vpop.f32.mrb[3].mxu0 }
  0xe8   :  { %v3978_v33 = vpop.f32.mrb[3].mxu1  ;;  %v1530_v34 = vsel %vm1523_vm11, %v4949_v27, -inf  ;;  %v4954_v41 = vsel %vm1462_vm13, %v393_v30, -10000.0  ;;  %v1412_v25 = vpop.permute.xlu1 %1411  ;;  %v1409_v30 = vrot.slane %v1405_v20, %v4793_v5 }
  0xe9   :  { %1531 = vmax.xlane.f32.xlu0 %v1530_v34  ;;  %v1533_v43 = vsel %vm1523_vm11, %v4954_v41, -inf  ;;  %v1416_v24 = vrot.slane %v1412_v25, %v4793_v5 }
  0xea   :  { %vm1467_vm4 = vcmp.lt.s32.totalorder %v4932_v56, %v1409_v30 }
  0xeb   :  { %vm1468_vm5 = vcmp.lt.s32.totalorder %v4932_v56, %v1416_v24 }
  0xed   :  { %1534 = vmax.xlane.f32.xlu0 %v1533_v43 }
  0xee   :  { %v472_v44 = vpop.f32.mrb[4].mxu0 }
  0xef   :  { %v551_v3 = vpop.f32.mrb[4].mxu1  ;;  %v3985_v45 = vpop.f32.mrb[5].mxu0  ;;  %v4965_v4 = vsel %vm1463_vm15, %v472_v44, -10000.0 }
  0xf0   :  { %v4962_v51 = vsel %vm1464_vm14, %v551_v3, -10000.0  ;;  %v3992_v52 = vpop.f32.mrb[5].mxu1  ;;  %v1536_v57 = vsel %vm1523_vm11, %v4965_v4, -inf  ;;  %v1419_v44 = vpop.permute.xlu0 %1418 }
  0xf1   :  { %v1539_v8 = vsel %vm1523_vm11, %v4962_v51, -inf  ;;  %1537 = vmax.xlane.f32.xlu1 %v1536_v57  ;;  %v1426_v45 = vpop.permute.xlu1 %1425  ;;  %v1423_v36 = vrot.slane %v1419_v44, %v4793_v5 }
  0xf2   :  { %1540 = vmax.xlane.f32.xlu0 %v1539_v8  ;;  %v1430_v48 = vrot.slane %v1426_v45, %v4793_v5 }
  0xf3   :  { %vm1469_vm6 = vcmp.lt.s32.totalorder %v4932_v56, %v1423_v36 }
  0xf4   :  { %vm1470_vm7 = vcmp.lt.s32.totalorder %v4932_v56, %v1430_v48 }
  0xf5   :  { %v1440_v20 = vpop.permute.xlu1 %1439 }
  0xf6   :  { %v630_v1 = vpop.f32.mrb[6].mxu0  ;;  %v1444_v25 = vrot.slane %v1440_v20, %v4793_v5 }
  0xf7   :  { %v4973_v2 = vsel %vm1465_vm1, %v630_v1, -10000.0  ;;  %v709_v10 = vpop.f32.mrb[6].mxu1  ;;  %v3999_v11 = vpop.f32.mrb[7].mxu0 }
  0xf8   :  { %v4975_v53 = vsel %vm1466_vm3, %v709_v10, -10000.0  ;;  %v4006_v16 = vpop.f32.mrb[7].mxu1  ;;  %v1542_v19 = vsel %vm1523_vm11, %v4973_v2, -inf  ;;  %vm1472_vm9 = vcmp.lt.s32.totalorder %v4932_v56, %v1444_v25  ;;  %v1757_v25 = vrot.slane %v4722_v50, %v4793_v5 }
  0xf9   :  { %v1545_v22 = vsel %vm1523_vm11, %v4975_v53, -inf  ;;  %1543 = vmax.xlane.f32.xlu1 %v1542_v19  ;;  %v1433_v16 = vpop.permute.xlu0 %1432  ;;  %v1454_v45 = vpop.permute.xlu1 %1453 }
  0xfa   :  { %1546 = vmax.xlane.f32.xlu0 %v1545_v22  ;;  %v1437_v22 = vrot.slane %v1433_v16, %v4793_v5  ;;  %v1458_v48 = vrot.slane %v1454_v45, %v4793_v5  ;;  %vm1791_vm14 = vcmp.lt.s32.totalorder %v4768_v62, %v1757_v25 }
  0xfc   :  { %vm1471_vm8 = vcmp.lt.s32.totalorder %v4932_v56, %v1437_v22  ;;  %vm1474_vm12 = vcmp.lt.s32.totalorder %v4932_v56, %v1458_v48  ;;  %v1749_v22 = vrot.slane %v4684_v42, %v4793_v5  ;;  %v1807_v42 = vsel %vm1791_vm14, 1, %v5648_v9 }
  0xfd   :  { %v1447_v44 = vpop.permute.xlu0 %1446  ;;  %v1816_v50 = vpop.permute.xlu1 %1815 }
  0xfe   :  { %v788_v31 = vpop.f32.mrb[8].mxu0  ;;  %v1451_v36 = vrot.slane %v1447_v44, %v4793_v5  ;;  %vm1789_vm13 = vcmp.lt.s32.totalorder %v4768_v62, %v1749_v22  ;;  %vm1862_vm3 = vcmp.eq.s32.totalorder %v1816_v50, 1 }
  0xff   :  { %v4984_v33 = vsel %vm1467_vm4, %v788_v31, -10000.0  ;;  %v867_v34 = vpop.f32.mrb[8].mxu1  ;;  %v4013_v37 = vpop.f32.mrb[9].mxu0 }
 0x100   :  { %v4987_v39 = vsel %vm1468_vm5, %v867_v34, -10000.0  ;;  %v4020_v43 = vpop.f32.mrb[9].mxu1  ;;  %v1548_v28 = vsel %vm1523_vm11, %v4984_v33, -inf  ;;  %vm1473_vm10 = vcmp.lt.s32.totalorder %v4932_v56, %v1451_v36  ;;  %v1745_v56 = vrot.slane %v4706_v47, %v4793_v5 }
 0x101   :  { %v1551_v3 = vsel %vm1523_vm11, %v4987_v39, -inf  ;;  %1549 = vmax.xlane.f32.xlu1 %v1548_v28 }
 0x102   :  { %1552 = vmax.xlane.f32.xlu0 %v1551_v3  ;;  %vm1788_vm15 = vcmp.lt.s32.totalorder %v4768_v62, %v1745_v56 }
 0x106   :  { %v946_v52 = vpop.f32.mrb[10].mxu0 }
 0x107   :  { %v4996_v55 = vsel %vm1469_vm6, %v946_v52, -10000.0  ;;  %v1025_v8 = vpop.f32.mrb[10].mxu1  ;;  %v4027_v57 = vpop.f32.mrb[11].mxu0 }
 0x108   :  { %5676 = vst [vmem:[#allocation9_spill] sm:$0xff] %v4996_v55  ;;  %v4999_v1 = vsel %vm1470_vm7, %v1025_v8, -10000.0  ;;  %v4034_v10 = vpop.f32.mrb[11].mxu1  ;;  %v1554_v11 = vsel %vm1523_vm11, %v4996_v55, -inf }
 0x109   :  { %5677 = vst [vmem:[#allocation10_spill] sm:$0xff] %v4999_v1  ;;  %v1557_v19 = vsel %vm1523_vm11, %v4999_v1, -inf  ;;  %1555 = vmax.xlane.f32.xlu1 %v1554_v11 }
 0x10a   :  { %1558 = vmax.xlane.f32.xlu0 %v1557_v19 }
 0x10e   :  { %v1104_v30 = vpop.f32.mrb[12].mxu0 }
 0x10f   :  { %v5008_v24 = vsel %vm1471_vm8, %v1104_v30, -10000.0  ;;  %v1183_v31 = vpop.f32.mrb[12].mxu1  ;;  %v4041_v34 = vpop.f32.mrb[13].mxu0  ;;  %v1805_v30 = vsel %vm1789_vm13, 1, %v5648_v9 }
 0x110   :  { %5678 = vst [vmem:[#allocation11_spill] sm:$0xff] %v5008_v24  ;;  %v5011_v37 = vsel %vm1472_vm9, %v1183_v31, -10000.0  ;;  %v4048_v43 = vpop.f32.mrb[13].mxu1  ;;  %v1560_v28 = vsel %vm1523_vm11, %v5008_v24, -inf  ;;  %v1753_v31 = vrot.slane %v4738_v54, %v4793_v5  ;;  %v1804_v34 = vsel %vm1788_vm15, 1, %v5648_v9 }
 0x111   :  { %5679 = vst [vmem:[#allocation12_spill] sm:$0xff] %v5011_v37  ;;  %v1563_v3 = vsel %vm1523_vm11, %v5011_v37, -inf  ;;  %1561 = vmax.xlane.f32.xlu1 %v1560_v28  ;;  %v5045_v43 = vpop.permute.xlu1 %1821  ;;  %v1819_v28 = vpop.permute.xlu0 %1818 }
 0x112   :  { %1564 = vmax.xlane.f32.xlu0 %v1563_v3  ;;  %vm1790_vm1 = vcmp.lt.s32.totalorder %v4768_v62, %v1753_v31  ;;  %vm1863_vm4 = vcmp.eq.s32.totalorder %v1819_v28, 1  ;;  %vm1864_vm5 = vcmp.eq.s32.totalorder %v5045_v43, 1 }
 0x113   :  { %v1806_v47 = vsel %vm1790_vm1, 1, %v5648_v9 }
 0x115   :  { %v5047_v44 = vpop.permute.xlu1 %1824  ;;  %v5049_v54 = vpop.permute.xlu0 %1827 }
 0x116   :  { %v1262_v52 = vpop.f32.mrb[14].mxu0  ;;  %vm1866_vm6 = vcmp.eq.s32.totalorder %v5049_v54, 1  ;;  %vm1865_vm7 = vcmp.eq.s32.totalorder %v5047_v44, 1 }
 0x117   :  { %v5020_v8 = vsel %vm1473_vm10, %v1262_v52, -10000.0  ;;  %v1341_v57 = vpop.f32.mrb[14].mxu1  ;;  %v4055_v10 = vpop.f32.mrb[15].mxu0  ;;  %v5113_v54 = vsel %vm1866_vm6, %v4965_v4, -10000.0 }
 0x118   :  { %5680 = vst [vmem:[#allocation13_spill] sm:$0xff] %v5020_v8  ;;  %v5023_v11 = vsel %vm1474_vm12, %v1341_v57, -10000.0  ;;  %v4062_v16 = vpop.f32.mrb[15].mxu1  ;;  %v1566_v19 = vsel %vm1523_vm11, %v5020_v8, -inf  ;;  %v1922_v9 = vsel %vm1523_vm11, %v5113_v54, -inf }
 0x119   :  { %5681 = vst [vmem:[#allocation14_spill] sm:$0xff] %v5023_v11  ;;  %v1569_v20 = vsel %vm1523_vm11, %v5023_v11, -inf  ;;  %1567 = vmax.xlane.f32.xlu1 %v1566_v19  ;;  %v5051_v3 = vpop.permute.xlu1 %1830 }
 0x11a   :  { %1570 = vmax.xlane.f32.xlu0 %v1569_v20  ;;  %vm1867_vm8 = vcmp.eq.s32.totalorder %v5051_v3, 1 }
 0x12a   :  { %1836 = vperm.xlu1 %4292, %v1805_v30  }
 0x12e   :  { %1842 = vperm.xlu1 %4292, %v1807_v42  }
 0x130   :  { %1833 = vperm.xlu0 %4291, %v1804_v34  }
 0x134   :  { %1839 = vperm.xlu0 %4291, %v1806_v47  }
 0x16e   :  { %v1526_v45 = vpop.xlane.xlu0 %1525 }
 0x16f   :  { %v1572_v36 = vsub.f32 %v4937_v60, %v1526_v45  ;;  %v1529_v48 = vpop.xlane.xlu1 %1528 }
 0x170   :  { %v1573_v52 = vsub.f32 %v4940_v12, %v1529_v48 }
 0x171   :  { %v1588_v57 = vmul.f32 1.442695, %v1572_v36 }
 0x172   :  { %v1590_v10 = vmul.f32 1.442695, %v1573_v52 }
 0x173   :  { %4293 = vpow2.f32 %v1588_v57 }
 0x174   :  { %4295 = vpow2.f32 %v1590_v10 }
 0x176   :  { %v1532_v16 = vpop.xlane.xlu0 %1531 }
 0x177   :  { %v1574_v19 = vsub.f32 %v4949_v27, %v1532_v16 }
 0x179   :  { %v1592_v20 = vmul.f32 1.442695, %v1574_v19 }
 0x17a   :  { %v1535_v22 = vpop.xlane.xlu0 %1534 }
 0x17b   :  { %4297 = vpow2.f32 %v1592_v20  ;;  %v1575_v25 = vsub.f32 %v4954_v41, %v1535_v22 }
 0x17d   :  { %v5057_v56 = vpop.eup %4293  ;;  %v1594_v30 = vmul.f32 1.442695, %v1575_v25 }
 0x17e   :  { %v5059_v31 = vpop.eup %4295  ;;  %v1620_v42 = vsel %vm1523_vm11, %v5057_v56, 0.0  ;;  %v1538_v36 = vpop.xlane.xlu1 %1537 }
 0x17f   :  { %4299 = vpow2.f32 %v1594_v30  ;;  %1621 = vadd.xlane.f32.xlu1 %v1620_v42  ;;  %v1623_v34 = vsel %vm1523_vm11, %v5059_v31, 0.0  ;;  %v1541_v47 = vpop.xlane.xlu0 %1540  ;;  %v1576_v48 = vsub.f32 %v4965_v4, %v1538_v36 }
 0x180   :  { %1624 = vadd.xlane.f32.xlu0 %v1623_v34  ;;  %v1577_v45 = vsub.f32 %v4962_v51, %v1541_v47 }
 0x181   :  { %v1596_v10 = vmul.f32 1.442695, %v1576_v48 }
 0x182   :  { %v1598_v52 = vmul.f32 1.442695, %v1577_v45 }
 0x184   :  { %4301 = vpow2.f32 %v1598_v52 }
 0x185   :  { %v5067_v57 = vpop.eup %4297  ;;  %4303 = vpow2.f32 %v1596_v10  ;;  %v5081_v10 = vsel %vm1862_vm3, %v4937_v60, -10000.0 }
 0x186   :  { %v1544_v16 = vpop.xlane.xlu1 %1543  ;;  %v1626_v19 = vsel %vm1523_vm11, %v5067_v57, 0.0  ;;  %v1894_v60 = vsel %vm1523_vm11, %v5081_v10, -inf }
 0x187   :  { %v1547_v20 = vpop.xlane.xlu0 %1546  ;;  %v1578_v22 = vsub.f32 %v4973_v2, %v1544_v16  ;;  %1627 = vadd.xlane.f32.xlu1 %v1626_v19 }
 0x188   :  { %v1579_v25 = vsub.f32 %v4975_v53, %v1547_v20  ;;  %v5087_v20 = vsel %vm1863_vm4, %v4940_v12, -10000.0 }
 0x189   :  { %v5073_v30 = vpop.eup %4299  ;;  %v1600_v42 = vmul.f32 1.442695, %v1578_v22 }
 0x18a   :  { %v1602_v34 = vmul.f32 1.442695, %v1579_v25  ;;  %v1629_v47 = vsel %vm1523_vm11, %v5073_v30, 0.0 }
 0x18b   :  { %4305 = vpow2.f32 %v1600_v42  ;;  %1630 = vadd.xlane.f32.xlu0 %v1629_v47  ;;  %v1901_v42 = vsel %vm1523_vm11, %v5087_v20, -inf  ;;  %v1895_v47 = vrot.slane %v1894_v60, 4 }
 0x18c   :  { %4307 = vpow2.f32 %v1602_v34 }
 0x18e   :  { %v1550_v45 = vpop.xlane.xlu1 %1549  ;;  %v5078_v52 = vpop.eup %4301 }
 0x18f   :  { %v1553_v36 = vpop.xlane.xlu0 %1552  ;;  %v1580_v48 = vsub.f32 %v4984_v33, %v1550_v45  ;;  %v5084_v19 = vpop.eup %4303  ;;  %v1635_v50 = vsel %vm1523_vm11, %v5078_v52, 0.0 }
 0x190   :  { %v1581_v16 = vsub.f32 %v4987_v39, %v1553_v36  ;;  %1636 = vadd.xlane.f32.xlu0 %v1635_v50  ;;  %v1632_v25 = vsel %vm1523_vm11, %v5084_v19, 0.0 }
 0x191   :  { %v1604_v22 = vmul.f32 1.442695, %v1580_v48  ;;  %1633 = vadd.xlane.f32.xlu1 %v1632_v25  ;;  %v1902_v48 = vrot.slane %v1901_v42, 4  ;;  %v1896_v25 = vmax.f32 %v1894_v60, %v1895_v47 }
 0x192   :  { %v1606_v28 = vmul.f32 1.442695, %v1581_v16  ;;  %v5107_v16 = vsel %vm1864_vm5, %v4949_v27, -10000.0  ;;  %v5119_v27 = vsel %vm1865_vm7, %v4954_v41, -10000.0  ;;  %v1923_v41 = vrot.slane %v1922_v9, 4 }
 0x193   :  { %4309 = vpow2.f32 %v1604_v22  ;;  %v1908_v0 = vsel %vm1523_vm11, %v5107_v16, -inf  ;;  %v1915_v60 = vsel %vm1523_vm11, %v5119_v27, -inf }
 0x194   :  { %4311 = vpow2.f32 %v1606_v28 }
 0x195   :  { %v5098_v12 = vpop.eup %4305 }
 0x196   :  { %v5101_v34 = vpop.eup %4307  ;;  %v1556_v45 = vpop.xlane.xlu1 %1555  ;;  %v1638_v36 = vsel %vm1523_vm11, %v5098_v12, 0.0 }
 0x197   :  { %v1559_v22 = vpop.xlane.xlu0 %1558  ;;  %v1582_v43 = vsub.f32 %v4996_v55, %v1556_v45  ;;  %v1641_v50 = vsel %vm1523_vm11, %v5101_v34, 0.0  ;;  %1639 = vadd.xlane.f32.xlu1 %v1638_v36  ;;  %v1903_v45 = vmax.f32 %v1901_v42, %v1902_v48  ;;  %v1909_v36 = vrot.slane %v1908_v0, 4 }
 0x198   :  { %v1583_v44 = vsub.f32 %v4999_v1, %v1559_v22  ;;  %1642 = vadd.xlane.f32.xlu0 %v1641_v50  ;;  %v1897_v22 = vrot.slane %v1896_v25, 2  ;;  %v5133_v50 = vsel %vm1867_vm8, %v4962_v51, -10000.0  ;;  %v1924_v1 = vmax.f32 %v1922_v9, %v1923_v41 }
 0x199   :  { %v1608_v28 = vmul.f32 1.442695, %v1582_v43  ;;  %v1904_v48 = vrot.slane %v1903_v45, 2  ;;  %v1910_v40 = vmax.f32 %v1908_v0, %v1909_v36  ;;  %v1929_v18 = vsel %vm1523_vm11, %v5133_v50, -inf }
 0x19a   :  { %v1610_v7 = vmul.f32 1.442695, %v1583_v44  ;;  %v1898_v61 = vmax.f32 %v1896_v25, %v1897_v22 }
 0x19b   :  { %4313 = vpow2.f32 %v1608_v28  ;;  %v1916_v28 = vrot.slane %v1915_v60, 4  ;;  %v1905_v51 = vmax.f32 %v1903_v45, %v1904_v48 }
 0x19c   :  { %4315 = vpow2.f32 %v1610_v7  ;;  %v1899_v36 = vrot.slane %v1898_v61, 1 }
 0x19d   :  { %v5124_v4 = vpop.eup %4309  ;;  %v1917_v58 = vmax.f32 %v1915_v60, %v1916_v28  ;;  %v1906_v9 = vrot.slane %v1905_v51, 1 }
 0x19e   :  { %5682 = vst [vmem:[#allocation15_spill] sm:$0xff] %v5124_v4  ;;  %v5128_v47 = vpop.eup %4311  ;;  %v1562_v43 = vpop.xlane.xlu1 %1561  ;;  %v1644_v42 = vsel %vm1523_vm11, %v5124_v4, 0.0 }
 0x19f   :  { %5683 = vst [vmem:[#allocation16_spill] sm:$0xff] %v5128_v47  ;;  %v1565_v3 = vpop.xlane.xlu0 %1564  ;;  %v1584_v7 = vsub.f32 %v5008_v24, %v1562_v43  ;;  %v1647_v44 = vsel %vm1523_vm11, %v5128_v47, 0.0  ;;  %1645 = vadd.xlane.f32.xlu1 %v1644_v42  ;;  %v1911_v24 = vrot.slane %v1910_v40, 2  ;;  %v1930_v42 = vrot.slane %v1929_v18, 4 }
 0x1a0   :  { %v1585_v55 = vsub.f32 %v5011_v37, %v1565_v3  ;;  %1648 = vadd.xlane.f32.xlu0 %v1647_v44  ;;  %v1925_v3 = vrot.slane %v1924_v1, 2  ;;  %v1907_v37 = vmax.f32 %v1905_v51, %v1906_v9 }
 0x1a1   :  { %v1612_v32 = vmul.f32 1.442695, %v1584_v7  ;;  %v1912_v45 = vmax.f32 %v1910_v40, %v1911_v24  ;;  %v1931_v60 = vmax.f32 %v1929_v18, %v1930_v42 }
 0x1a2   :  { %v1614_v13 = vmul.f32 1.442695, %v1585_v55  ;;  %v1926_v48 = vmax.f32 %v1924_v1, %v1925_v3 }
 0x1a3   :  { %4317 = vpow2.f32 %v1612_v32 }
 0x1a4   :  { %4319 = vpow2.f32 %v1614_v13  ;;  %v1918_v13 = vrot.slane %v1917_v58, 2  ;;  %v1927_v1 = vrot.slane %v1926_v48, 1 }
 0x1a5   :  { %v5141_v43 = vpop.eup %4313 }
 0x1a6   :  { %5684 = vst [vmem:[#allocation17_spill] sm:$0xff] %v5141_v43  ;;  %v5143_v47 = vpop.eup %4315  ;;  %v1568_v44 = vpop.xlane.xlu1 %1567  ;;  %v1650_v0 = vsel %vm1523_vm11, %v5141_v43, 0.0  ;;  %v1900_v43 = vmax.f32 %v1898_v61, %v1899_v36  ;;  %v1919_v4 = vmax.f32 %v1917_v58, %v1918_v13  ;;  %v2007_v58 = vsub.f32 %v5087_v20, %v1907_v37 }
 0x1a7   :  { %v1571_v41 = vpop.xlane.xlu0 %1570  ;;  %v1586_v55 = vsub.f32 %v5020_v8, %v1568_v44  ;;  %v1653_v32 = vsel %vm1523_vm11, %v5143_v47, 0.0  ;;  %1651 = vadd.xlane.f32.xlu1 %v1650_v0  ;;  %v1913_v8 = vrot.slane %v1912_v45, 1 }
 0x1a8   :  { %v1587_v25 = vsub.f32 %v5023_v11, %v1571_v41  ;;  %1654 = vadd.xlane.f32.xlu0 %v1653_v32  ;;  %v1932_v41 = vrot.slane %v1931_v60, 2  ;;  %v1920_v9 = vrot.slane %v1919_v4, 1 }
 0x1a9   :  { %v1616_v22 = vmul.f32 1.442695, %v1586_v55  ;;  %v1914_v32 = vmax.f32 %v1912_v45, %v1913_v8 }
 0x1aa   :  { %v1618_v7 = vmul.f32 1.442695, %v1587_v25  ;;  %v1837_v28 = vpop.permute.xlu1 %1836  ;;  %v1933_v13 = vmax.f32 %v1931_v60, %v1932_v41 }
 0x1ab   :  { %4321 = vpow2.f32 %v1616_v22  ;;  %vm1869_vm9 = vcmp.eq.s32.totalorder %v1837_v28, 1  ;;  %v2008_v8 = vsub.f32 %v5107_v16, %v1914_v32 }
 0x1ac   :  { %4323 = vpow2.f32 %v1618_v7  ;;  %v5152_v44 = vsel %vm1869_vm9, %v4975_v53, -10000.0  ;;  %v2006_v53 = vsub.f32 %v5081_v10, %v1900_v43  ;;  %v1928_v10 = vmax.f32 %v1926_v48, %v1927_v1 }
 0x1ad   :  { %v5154_v0 = vpop.eup %4317  ;;  %v1943_v18 = vsel %vm1523_vm11, %v5152_v44, -inf }
 0x1ae   :  { %v5158_v40 = vpop.eup %4319  ;;  %v1944_v24 = vrot.slane %v1943_v18, 4  ;;  %v1843_v51 = vpop.permute.xlu1 %1842  ;;  %v1656_v61 = vsel %vm1523_vm11, %v5154_v0, 0.0  ;;  %v2022_v7 = vmul.f32 1.442695, %v2006_v53  ;;  %v2010_v41 = vsub.f32 %v5113_v54, %v1928_v10 }
 0x1af   :  { %v1834_v42 = vpop.permute.xlu0 %1833  ;;  %vm1871_vm10 = vcmp.eq.s32.totalorder %v1843_v51, 1  ;;  %v1659_v3 = vsel %vm1523_vm11, %v5158_v40, 0.0  ;;  %1657 = vadd.xlane.f32.xlu1 %v1656_v61  ;;  %v1921_v51 = vmax.f32 %v1919_v4, %v1920_v9 }
 0x1b0   :  { %v1945_v36 = vmax.f32 %v1943_v18, %v1944_v24  ;;  %vm1868_vm12 = vcmp.eq.s32.totalorder %v1834_v42, 1  ;;  %v5167_v55 = vsel %vm1871_vm10, %v4987_v39, -10000.0  ;;  %1660 = vadd.xlane.f32.xlu0 %v1659_v3  ;;  %v2024_v24 = vmul.f32 1.442695, %v2007_v58 }
 0x1b1   :  { %v1884_v25 = vsel %vm1868_vm12, %v4973_v2, -10000.0  ;;  %v1957_v37 = vsel %vm1523_vm11, %v5167_v55, -inf  ;;  %v1934_v2 = vrot.slane %v1933_v13, 1  ;;  %4325 = vpow2.f32 %v2022_v7 }
 0x1b2   :  { %v1946_v20 = vrot.slane %v1945_v36, 2  ;;  %v1936_v43 = vsel %vm1523_vm11, %v1884_v25, -inf  ;;  %v1958_v22 = vrot.slane %v1957_v37, 4  ;;  %4327 = vpow2.f32 %v2024_v24 }
 0x1b3   :  { %v1937_v28 = vrot.slane %v1936_v43, 4  ;;  %v1840_v18 = vpop.permute.xlu0 %1839  ;;  %v2009_v54 = vsub.f32 %v5119_v27, %v1921_v51 }
 0x1b4   :  { %v1959_v39 = vmax.f32 %v1957_v37, %v1958_v22  ;;  %vm1870_vm13 = vcmp.eq.s32.totalorder %v1840_v18, 1  ;;  %v1947_v1 = vmax.f32 %v1945_v36, %v1946_v20  ;;  %v2030_v36 = vmul.f32 1.442695, %v2010_v41 }
 0x1b5   :  { %v5173_v61 = vpop.eup %4321  ;;  %v1938_v45 = vmax.f32 %v1936_v43, %v1937_v28  ;;  %v1886_v60 = vsel %vm1870_vm13, %v4984_v33, -10000.0  ;;  %v2026_v33 = vmul.f32 1.442695, %v2008_v8  ;;  %v1935_v37 = vmax.f32 %v1933_v13, %v1934_v2 }
 0x1b6   :  { %v5177_v48 = vpop.eup %4323  ;;  %v1950_v53 = vsel %vm1523_vm11, %v1886_v60, -inf  ;;  %v1662_v4 = vsel %vm1523_vm11, %v5173_v61, 0.0  ;;  %v1960_v42 = vrot.slane %v1959_v39, 2  ;;  %v1948_v10 = vrot.slane %v1947_v1, 1 }
 0x1b7   :  { %v1939_v58 = vrot.slane %v1938_v45, 2  ;;  %v1951_v3 = vrot.slane %v1950_v53, 4  ;;  %v1665_v16 = vsel %vm1523_vm11, %v5177_v48, 0.0  ;;  %1663 = vadd.xlane.f32.xlu1 %v1662_v4  ;;  %4329 = vpow2.f32 %v2026_v33 }
 0x1b8   :  { %1666 = vadd.xlane.f32.xlu0 %v1665_v16  ;;  %v1961_v43 = vmax.f32 %v1959_v39, %v1960_v42  ;;  %v1765_v4 = vrot.slane %v4760_v59, %v4793_v5  ;;  %v2028_v7 = vmul.f32 1.442695, %v2009_v54  ;;  %4331 = vpow2.f32 %v2030_v36 }
 0x1b9   :  { %v1940_v9 = vmax.f32 %v1938_v45, %v1939_v58  ;;  %v1952_v32 = vmax.f32 %v1950_v53, %v1951_v3  ;;  %v2011_v24 = vsub.f32 %v5133_v50, %v1935_v37  ;;  %v1949_v8 = vmax.f32 %v1947_v1, %v1948_v10 }
 0x1ba   :  { %v1962_v53 = vrot.slane %v1961_v43, 1  ;;  %v1773_v39 = vrot.slane %v4798_v6, %v4793_v5  ;;  %4333 = vpow2.f32 %v2028_v7  ;;  %vm1793_vm14 = vcmp.lt.s32.totalorder %v4768_v62, %v1765_v4 }
 0x1bb   :  { %v1941_v20 = vrot.slane %v1940_v9, 1  ;;  %v1953_v22 = vrot.slane %v1952_v32, 2  ;;  %v5189_v2 = vpop.eup %4325  ;;  %v2032_v41 = vmul.f32 1.442695, %v2011_v24  ;;  %v2013_v58 = vsub.f32 %v5152_v44, %v1949_v8 }
 0x1bc   :  { %v5194_v59 = vpop.eup %4327  ;;  %v1963_v50 = vmax.f32 %v1961_v43, %v1962_v53  ;;  %v1761_v1 = vrot.slane %v4779_v63, %v4793_v5  ;;  %v2054_v42 = vsel %vm1523_vm11, %v5189_v2, 0.0  ;;  %v5685_v16 = vmov 0  }
 0x1bd   :  { %v1942_v28 = vmax.f32 %v1940_v9, %v1941_v20  ;;  %v1954_v18 = vmax.f32 %v1952_v32, %v1953_v22  ;;  %v1809_v6 = vsel %vm1793_vm14, 1, %v5685_v16  ;;  %v1781_v33 = vrot.slane %v4840_v21, %v4793_v5 }
 0x1be   :  { %v2061_v9 = vsel %vm1523_vm11, %v5194_v59, 0.0  ;;  %vm1795_vm15 = vcmp.lt.s32.totalorder %v4768_v62, %v1773_v39  ;;  %v2015_v63 = vsub.f32 %v5167_v55, %v1963_v50  ;;  %v1769_v54 = vrot.slane %v4820_v14, %v4793_v5 }
 0x1bf   :  { %v2012_v45 = vsub.f32 %v1884_v25, %v1942_v28  ;;  %v1955_v27 = vrot.slane %v1954_v18, 1  ;;  %v2055_v36 = vrot.slane %v2054_v42, 4  ;;  %vm1792_vm1 = vcmp.lt.s32.totalorder %v4768_v62, %v1761_v1 }
 0x1c0   :  { %v2062_v21 = vrot.slane %v2061_v9, 4  ;;  %v1811_v37 = vsel %vm1795_vm15, 1, %v5685_v16  ;;  %vm1797_vm3 = vcmp.lt.s32.totalorder %v4768_v62, %v1781_v33  ;;  %v2040_v20 = vmul.f32 1.442695, %v2015_v63 }
 0x1c1   :  { %v2034_v51 = vmul.f32 1.442695, %v2012_v45  ;;  %v1956_v13 = vmax.f32 %v1954_v18, %v1955_v27  ;;  %v5207_v44 = vpop.eup %4329  ;;  %v1808_v43 = vsel %vm1792_vm1, 1, %v5685_v16  ;;  %v1777_v22 = vrot.slane %v4858_v29, %v4793_v5 }
 0x1c2   :  { %v5210_v32 = vpop.eup %4331  ;;  %v2068_v10 = vsel %vm1523_vm11, %v5207_v44, 0.0  ;;  %v2056_v28 = vadd.f32 %v2055_v36, %v2054_v42  ;;  %vm1794_vm4 = vcmp.lt.s32.totalorder %v4768_v62, %v1769_v54  ;;  %v2063_v4 = vadd.f32 %v2062_v21, %v2061_v9 }
 0x1c3   :  { %4335 = vpow2.f32 %v2034_v51  ;;  %v2014_v25 = vsub.f32 %v1886_v60, %v1956_v13  ;;  %v2036_v60 = vmul.f32 1.442695, %v2013_v58  ;;  %v2082_v55 = vsel %vm1523_vm11, %v5210_v32, 0.0 }
 0x1c4   :  { %4337 = vpow2.f32 %v2032_v41  ;;  %v5222_v14 = vpop.eup %4333  ;;  %v1813_v7 = vsel %vm1797_vm3, 1, %v5685_v16  ;;  %v2069_v24 = vrot.slane %v2068_v10, 4  ;;  %v2083_v8 = vrot.slane %v2082_v55, 4 }
 0x1c5   :  { %v2038_v3 = vmul.f32 1.442695, %v2014_v25  ;;  %v2075_v45 = vsel %vm1523_vm11, %v5222_v14, 0.0  ;;  %v1810_v29 = vsel %vm1794_vm4, 1, %v5685_v16  ;;  %v2057_v51 = vrot.slane %v2056_v28, 2 }
 0x1c6   :  { %vm1796_vm5 = vcmp.lt.s32.totalorder %v4768_v62, %v1777_v22  ;;  %v2064_v39 = vrot.slane %v2063_v4, 2  ;;  %v2076_v41 = vrot.slane %v2075_v45, 4  ;;  %v2084_v58 = vadd.f32 %v2083_v8, %v2082_v55 }
 0x1c7   :  { %4339 = vpow2.f32 %v2038_v3  ;;  %v2070_v25 = vadd.f32 %v2069_v24, %v2068_v10  ;;  %v1812_v42 = vsel %vm1796_vm5, 1, %v5685_v16 }
 0x1c8   :  { %1848 = vperm.xlu1 %4292, %v1809_v6   ;;  %4341 = vpow2.f32 %v2036_v60  ;;  %v2058_v6 = vadd.f32 %v2057_v51, %v2056_v28  ;;  %v2065_v62 = vadd.f32 %v2064_v39, %v2063_v4  ;;  %v2077_v9 = vadd.f32 %v2076_v41, %v2075_v45 }
 0x1c9   :  { %4343 = vpow2.f32 %v2040_v20  ;;  %v2085_v60 = vrot.slane %v2084_v58, 2  ;;  %v2071_v21 = vrot.slane %v2070_v25, 2 }
 0x1ca   :  { %v2059_v10 = vrot.slane %v2058_v6, 1  ;;  %v2066_v16 = vrot.slane %v2065_v62, 1  ;;  %v2078_v20 = vrot.slane %v2077_v9, 2 }
 0x1cb   :  { %v2086_v28 = vadd.f32 %v2085_v60, %v2084_v58  ;;  %v2072_v24 = vadd.f32 %v2071_v21, %v2070_v25 }
 0x1cc   :  { %1854 = vperm.xlu1 %4292, %v1811_v37   ;;  %v2060_v45 = vadd.f32 %v2059_v10, %v2058_v6  ;;  %v2079_v39 = vadd.f32 %v2078_v20, %v2077_v9 }
 0x1cd   :  { %v5227_v18 = vpop.eup %4335  ;;  %v2087_v51 = vrot.slane %v2086_v28, 1  ;;  %v2073_v11 = vrot.slane %v2072_v24, 1 }
 0x1ce   :  { %1845 = vperm.xlu0 %4291, %v1808_v43   ;;  %v2096_v53 = vsel %vm1523_vm11, %v5227_v18, 0.0  ;;  %v5235_v27 = vpop.eup %4337  ;;  %4345 = vrcp.f32 %v2060_v45  ;;  %v2080_v58 = vrot.slane %v2079_v39, 1 }
 0x1cf   :  { %v2097_v50 = vrot.slane %v2096_v53, 4  ;;  %v2089_v3 = vsel %vm1523_vm11, %v5235_v27, 0.0 }
 0x1d0   :  { %1860 = vperm.xlu1 %4292, %v1813_v7   ;;  %v2090_v36 = vrot.slane %v2089_v3, 4  ;;  %v2081_v6 = vadd.f32 %v2080_v58, %v2079_v39 }
 0x1d1   :  { %v5238_v13 = vpop.eup %4339  ;;  %v2098_v63 = vadd.f32 %v2097_v50, %v2096_v53  ;;  %v2067_v53 = vadd.f32 %v2066_v16, %v2065_v62 }
 0x1d2   :  { %1851 = vperm.xlu0 %4291, %v1810_v29   ;;  %v2110_v1 = vsel %vm1523_vm11, %v5238_v13, 0.0  ;;  %v5245_v33 = vpop.eup %4341  ;;  %v2091_v7 = vadd.f32 %v2090_v36, %v2089_v3  ;;  %v2074_v36 = vadd.f32 %v2073_v11, %v2072_v24 }
 0x1d3   :  { %v2111_v54 = vrot.slane %v2110_v1, 4  ;;  %v2103_v37 = vsel %vm1523_vm11, %v5245_v33, 0.0  ;;  %v5249_v55 = vpop.eup %4343  ;;  %v2099_v43 = vrot.slane %v2098_v63, 2  ;;  %4347 = vrcp.f32 %v2067_v53 }
 0x1d4   :  { %v2104_v4 = vrot.slane %v2103_v37, 4  ;;  %v2117_v8 = vsel %vm1523_vm11, %v5249_v55, 0.0  ;;  %v2092_v50 = vrot.slane %v2091_v7, 2 }
 0x1d5   :  { %v2112_v22 = vadd.f32 %v2111_v54, %v2110_v1  ;;  %v2100_v41 = vadd.f32 %v2099_v43, %v2098_v63  ;;  %v2118_v5 = vrot.slane %v2117_v8, 4  ;;  %v2088_v1 = vadd.f32 %v2087_v51, %v2086_v28 }
 0x1d6   :  { %1857 = vperm.xlu0 %4291, %v1812_v42   ;;  %v2105_v42 = vadd.f32 %v2104_v4, %v2103_v37  ;;  %v2093_v21 = vadd.f32 %v2092_v50, %v2091_v7 }
 0x1d7   :  { %v2113_v29 = vrot.slane %v2112_v22, 2  ;;  %v2101_v3 = vrot.slane %v2100_v41, 1  ;;  %v2119_v54 = vadd.f32 %v2118_v5, %v2117_v8  ;;  %4349 = vrcp.f32 %v2088_v1 }
 0x1d8   :  { %v2106_v25 = vrot.slane %v2105_v42, 2  ;;  %4351 = vrcp.f32 %v2074_v36  ;;  %v2094_v63 = vrot.slane %v2093_v21, 1  ;;  %v4346_v16 = vpop.eup %4345 }
 0x1d9   :  { %v2114_v60 = vadd.f32 %v2113_v29, %v2112_v22  ;;  %v2102_v62 = vadd.f32 %v2101_v3, %v2100_v41  ;;  %v2120_v9 = vrot.slane %v2119_v54, 2  ;;  %v2214_v8 = vmul.f32 %v4346_v16, %v5189_v2 }
 0x1da   :  { %v2107_v37 = vadd.f32 %v2106_v25, %v2105_v42  ;;  %v2095_v28 = vadd.f32 %v2094_v63, %v2093_v21 }
 0x1db   :  { %v2115_v10 = vrot.slane %v2114_v60, 1  ;;  %4353 = vrcp.f32 %v2102_v62  ;;  %v2121_v22 = vadd.f32 %v2120_v9, %v2119_v54  ;;  %v2230_v41 = vsel %vm1523_vm11, %v2214_v8, 0.0 }
 0x1dc   :  { %4355 = vrcp.f32 %v2081_v6  ;;  %v2108_v4 = vrot.slane %v2107_v37, 1 }
 0x1dd   :  { %v2116_v20 = vadd.f32 %v2115_v10, %v2114_v60  ;;  %v4348_v43 = vpop.eup %4347  ;;  %v2122_v7 = vrot.slane %v2121_v22, 1 }
 0x1de   :  { %v2215_v5 = vmul.f32 %v4348_v43, %v5194_v59  ;;  %v2109_v11 = vadd.f32 %v2108_v4, %v2107_v37 }
 0x1df   :  { %4357 = vrcp.f32 %v2116_v20  ;;  %v2123_v51 = vadd.f32 %v2122_v7, %v2121_v22 }
 0x1e0   :  { %4359 = vrcp.f32 %v2095_v28  ;;  %v2233_v53 = vsel %vm1523_vm11, %v2215_v5, 0.0 }
 0x1e1   :  { %v4350_v24 = vpop.eup %4349  ;;  %4361 = vrcp.f32 %v2109_v11 }
 0x1e2   :  { %v4352_v45 = vpop.eup %4351  ;;  %v2218_v29 = vmul.f32 %v4350_v24, %v5210_v32  ;;  %4363 = vrcp.f32 %v2123_v51 }
 0x1e3   :  { %v2216_v50 = vmul.f32 %v4352_v45, %v5207_v44 }
 0x1e4   :  { %v2242_v42 = vsel %vm1523_vm11, %v2218_v29, 0.0  ;;  %v5689_v29 = vld [vmem:[#allocation16_spill] sm:$0xff] }
 0x1e5   :  { %v4354_v39 = vpop.eup %4353  ;;  %v2236_v58 = vsel %vm1523_vm11, %v2216_v50, 0.0 }
 0x1e6   :  { %v4356_v59 = vpop.eup %4355  ;;  %v2220_v1 = vmul.f32 %v4354_v39, %v5227_v18 }
 0x1e7   :  { %v2217_v32 = vmul.f32 %v4356_v59, %v5222_v14 }
 0x1e8   :  { %v2248_v60 = vsel %vm1523_vm11, %v2220_v1, 0.0  ;;  %v5692_v1 = vld [vmem:[#allocation17_spill] sm:$0xff] }
 0x1e9   :  { %v4358_v2 = vpop.eup %4357  ;;  %v2239_v44 = vsel %vm1523_vm11, %v2217_v32, 0.0  ;;  %v5693_v32 = vld [vmem:[#allocation5_spill] sm:$0xff] }
 0x1ea   :  { %v4360_v3 = vpop.eup %4359  ;;  %v2222_v25 = vmul.f32 %v4358_v2, %v5238_v13 }
 0x1eb   :  { %v2219_v54 = vmul.f32 %v4360_v3, %v5235_v27  ;;  %v4362_v36 = vpop.eup %4361 }
 0x1ec   :  { %v2254_v18 = vsel %vm1523_vm11, %v2222_v25, 0.0  ;;  %v2221_v14 = vmul.f32 %v4362_v36, %v5245_v33  ;;  %v4364_v6 = vpop.eup %4363 }
 0x1ed   :  { %v2245_v21 = vsel %vm1523_vm11, %v2219_v54, 0.0  ;;  %v2223_v13 = vmul.f32 %v4364_v6, %v5249_v55 }
 0x1ee   :  { %v2251_v62 = vsel %vm1523_vm11, %v2221_v14, 0.0 }
 0x1ef   :  { %v2257_v10 = vsel %vm1523_vm11, %v2223_v13, 0.0  ;;  %v5697_v13 = vld [vmem:[#allocation8_spill] sm:$0xff] }
 0x1f4   :  { %2234 = vadd.xlane.f32.xlu1 %v2233_v53  ;;  %v5688_v53 = vld [vmem:[#allocation15_spill] sm:$0xff] }
 0x1f5   :  { %2231 = vadd.xlane.f32.xlu0 %v2230_v41  ;;  %v5691_v41 = vld [vmem:[#allocation3_spill] sm:$0xff] }
 0x1f8   :  { %2243 = vadd.xlane.f32.xlu1 %v2242_v42 }
 0x1f9   :  { %2237 = vadd.xlane.f32.xlu0 %v2236_v58 }
 0x1fc   :  { %2249 = vadd.xlane.f32.xlu1 %v2248_v60  ;;  %v5694_v60 = vld [vmem:[#allocation6_spill] sm:$0xff] }
 0x1fd   :  { %2240 = vadd.xlane.f32.xlu0 %v2239_v44 }
 0x200   :  { %2255 = vadd.xlane.f32.xlu1 %v2254_v18 }
 0x201   :  { %2246 = vadd.xlane.f32.xlu0 %v2245_v21  ;;  %v5695_v21 = vld [vmem:[#allocation10_spill] sm:$0xff] }
 0x205   :  { %2252 = vadd.xlane.f32.xlu0 %v2251_v62 }
 0x209   :  { %2258 = vadd.xlane.f32.xlu0 %v2257_v10 }
 0x20c   :  { %v1622_v27 = vpop.xlane.xlu1 %1621 }
 0x20d   :  { %v1625_v9 = vpop.xlane.xlu0 %1624  ;;  %4365 = vrcp.f32 %v1622_v27 }
 0x20e   :  { %4367 = vrcp.f32 %v1625_v9  ;;  %v5698_v9 = vld [vmem:[#allocation12_spill] sm:$0xff] }
 0x214   :  { %v1628_v63 = vpop.xlane.xlu1 %1627 }
 0x215   :  { %4369 = vrcp.f32 %v1628_v63 }
 0x217   :  { %v4366_v37 = vpop.eup %4365 }
 0x218   :  { %v4368_v16 = vpop.eup %4367  ;;  %v1684_v33 = vmul.f32 %v4366_v37, %v5057_v56  ;;  %v1631_v20 = vpop.xlane.xlu0 %1630  ;;  %v5686_v56 = vmov 0.0  }
 0x219   :  { %v1685_v43 = vmul.f32 %v4368_v16, %v5059_v31  ;;  %4371 = vrcp.f32 %v1631_v20  ;;  %v5687_v31 = vmov 0.0|0.0   ;;  %v5699_v16 = vld [vmem:[#allocation9_spill] sm:$0xff] }
 0x21a   :  { %1700 = vst.msk [vmem:[%s5642_s4] sm:$0xff] %vm1523_vm11, %v1684_v33  ;;  %4068 = vmatmul.mubr.msk.f32.vlgmr.msra.gmra.mrb[16].mxu0 %vm1523_vm11, %v1684_v33 }
 0x21b   :  { %1701 = vst.msk [vmem:[%s5642_s4 + $0x8] sm:$0xff] %vm1523_vm11, %v1685_v43  ;;  %4075 = vmatmul.mubr.msk.f32.vlgmr.msra.gmra.mrb[16].mxu1 %vm1523_vm11, %v1685_v43  ;;  %4247 = vmatpush3.bf16.msra.mxu0 %v4551_v15 }
 0x21c   :  { %4081 = vmatprep.mubr.msk.f32.mxu0 %vm4470_vm2, %v5686_v56  ;;  %4250 = vmatpush3.bf16.msra.mxu1 %v4556_v17 }
 0x21d   :  { %4088 = vmatprep.mubr.msk.f32.mxu1 %vm4470_vm2, %v5686_v56  ;;  %4251 = vmatprep.subr.bf16.mxu0 %v5687_v31  ;;  %v1637_v28 = vpop.xlane.xlu0 %1636 }
 0x21e   :  { %4254 = vmatprep.subr.bf16.mxu1 %v5687_v31  ;;  %4373 = vrcp.f32 %v1637_v28  ;;  %v1634_v22 = vpop.xlane.xlu1 %1633 }
 0x21f   :  { %v4370_v55 = vpop.eup %4369  ;;  %4375 = vrcp.f32 %v1634_v22 }
 0x220   :  { %v1686_v4 = vmul.f32 %v4370_v55, %v5067_v57 }
 0x222   :  { %1702 = vst.msk [vmem:[%s5642_s4 + $0x10] sm:$0xff] %vm1523_vm11, %v1686_v4  ;;  %4082 = vmatmul.mubr.msk.f32.vlgmr.msra.gmra.mrb[18].mxu0 %vm1523_vm11, %v1686_v4 }
 0x223   :  { %v4372_v15 = vpop.eup %4371  ;;  %4253 = vmatpush3.bf16.msra.mxu0 %v4587_v23  ;;  %4095 = vmatprep.mubr.msk.f32.mxu0 %vm4470_vm2, %v5686_v56 }
 0x224   :  { %v1687_v17 = vmul.f32 %v4372_v15, %v5073_v30  ;;  %v1640_v5 = vpop.xlane.xlu1 %1639  ;;  %4257 = vmatprep.subr.bf16.mxu0 %v5687_v31 }
 0x225   :  { %v1643_v57 = vpop.xlane.xlu0 %1642  ;;  %4377 = vrcp.f32 %v1640_v5 }
 0x226   :  { %1703 = vst.msk [vmem:[%s5642_s4 + $0x18] sm:$0xff] %vm1523_vm11, %v1687_v17  ;;  %4379 = vrcp.f32 %v1643_v57  ;;  %4089 = vmatmul.mubr.msk.f32.vlgmr.msra.gmra.mrb[18].mxu1 %vm1523_vm11, %v1687_v17 }
 0x227   :  { %4256 = vmatpush3.bf16.msra.mxu1 %v4597_v26  ;;  %4102 = vmatprep.mubr.msk.f32.mxu1 %vm4470_vm2, %v5686_v56 }
 0x228   :  { %4260 = vmatprep.subr.bf16.mxu1 %v5687_v31  ;;  %v4374_v23 = vpop.eup %4373 }
 0x229   :  { %v4376_v30 = vpop.eup %4375  ;;  %v1689_v11 = vmul.f32 %v4374_v23, %v5078_v52  ;;  %v5700_v23 = vld [vmem:[#allocation14_spill] sm:$0xff] }
 0x22a   :  { %v1688_v7 = vmul.f32 %v4376_v30, %v5084_v19  ;;  %v5701_v30 = vld [vmem:[#allocation11_spill] sm:$0xff] }
 0x22b   :  { %1705 = vst.msk [vmem:[%s5642_s4 + $0x28] sm:$0xff] %vm1523_vm11, %v1689_v11  ;;  %4103 = vmatmul.mubr.msk.f32.vlgmr.msra.gmra.mrb[20].mxu1 %vm1523_vm11, %v1689_v11 }
 0x22c   :  { %v1646_v24 = vpop.xlane.xlu1 %1645  ;;  %1704 = vst.msk [vmem:[%s5642_s4 + $0x20] sm:$0xff] %vm1523_vm11, %v1688_v7  ;;  %4096 = vmatmul.mubr.msk.f32.vlgmr.msra.gmra.mrb[20].mxu0 %vm1523_vm11, %v1688_v7  ;;  %4262 = vmatpush3.bf16.msra.mxu1 %v4657_v38 }
 0x22d   :  { %v1649_v26 = vpop.xlane.xlu0 %1648  ;;  %4381 = vrcp.f32 %v1646_v24  ;;  %4259 = vmatpush3.bf16.msra.mxu0 %v4646_v35  ;;  %4109 = vmatprep.mubr.msk.f32.mxu0 %vm4470_vm2, %v5686_v56 }
 0x22e   :  { %4383 = vrcp.f32 %v1649_v26  ;;  %4116 = vmatprep.mubr.msk.f32.mxu1 %vm4470_vm2, %v5686_v56  ;;  %4263 = vmatprep.subr.bf16.mxu0 %v5687_v31 }
 0x22f   :  { %v4378_v52 = vpop.eup %4377  ;;  %4266 = vmatprep.subr.bf16.mxu1 %v5687_v31 }
 0x230   :  { %v4380_v19 = vpop.eup %4379  ;;  %v1690_v8 = vmul.f32 %v4378_v52, %v5098_v12 }
 0x231   :  { %v1691_v45 = vmul.f32 %v4380_v19, %v5101_v34 }
 0x232   :  { %1706 = vst.msk [vmem:[%s5642_s4 + $0x30] sm:$0xff] %vm1523_vm11, %v1690_v8  ;;  %4110 = vmatmul.mubr.msk.f32.vlgmr.msra.gmra.mrb[22].mxu0 %vm1523_vm11, %v1690_v8 }
 0x233   :  { %1707 = vst.msk [vmem:[%s5642_s4 + $0x38] sm:$0xff] %vm1523_vm11, %v1691_v45  ;;  %4117 = vmatmul.mubr.msk.f32.vlgmr.msra.gmra.mrb[22].mxu1 %vm1523_vm11, %v1691_v45  ;;  %4265 = vmatpush3.bf16.msra.mxu0 %v4700_v46 }
 0x234   :  { %v1652_v35 = vpop.xlane.xlu1 %1651  ;;  %4268 = vmatpush3.bf16.msra.mxu1 %v4711_v49  ;;  %4123 = vmatprep.mubr.msk.f32.mxu0 %vm4470_vm2, %v5686_v56  ;;  %v5690_v49 = vld [vmem:[#allocation2_spill] sm:$0xff] }
 0x235   :  { %v1655_v38 = vpop.xlane.xlu0 %1654  ;;  %4385 = vrcp.f32 %v1652_v35  ;;  %4130 = vmatprep.mubr.msk.f32.mxu1 %vm4470_vm2, %v5686_v56  ;;  %4269 = vmatprep.subr.bf16.mxu0 %v5687_v31 }
 0x236   :  { %4387 = vrcp.f32 %v1655_v38  ;;  %4272 = vmatprep.subr.bf16.mxu1 %v5687_v31 }
 0x237   :  { %v4382_v12 = vpop.eup %4381 }
 0x238   :  { %v4384_v34 = vpop.eup %4383  ;;  %v1692_v46 = vmul.f32 %v4382_v12, %v5688_v53 }
 0x239   :  { %v1693_v51 = vmul.f32 %v4384_v34, %v5689_v29  ;;  %v5702_v29 = vld [vmem:[#allocation13_spill] sm:$0xff] }
 0x23a   :  { %1708 = vst.msk [vmem:[%s5642_s4 + $0x40] sm:$0xff] %vm1523_vm11, %v1692_v46  ;;  %4124 = vmatmul.mubr.msk.f32.vlgmr.msra.gmra.mrb[24].mxu0 %vm1523_vm11, %v1692_v46 }
 0x23b   :  { %1709 = vst.msk [vmem:[%s5642_s4 + $0x48] sm:$0xff] %vm1523_vm11, %v1693_v51  ;;  %4131 = vmatmul.mubr.msk.f32.vlgmr.msra.gmra.mrb[24].mxu1 %vm1523_vm11, %v1693_v51  ;;  %4271 = vmatpush3.bf16.msra.mxu0 %v5690_v49 }
 0x23c   :  { %v1658_v39 = vpop.xlane.xlu1 %1657  ;;  %4274 = vmatpush3.bf16.msra.mxu1 %v5691_v41  ;;  %4137 = vmatprep.mubr.msk.f32.mxu0 %vm4470_vm2, %v5686_v56 }
 0x23d   :  { %v1661_v50 = vpop.xlane.xlu0 %1660  ;;  %4389 = vrcp.f32 %v1658_v39  ;;  %4144 = vmatprep.mubr.msk.f32.mxu1 %vm4470_vm2, %v5686_v56  ;;  %4275 = vmatprep.subr.bf16.mxu0 %v5687_v31 }
 0x23e   :  { %4391 = vrcp.f32 %v1661_v50  ;;  %4278 = vmatprep.subr.bf16.mxu1 %v5687_v31 }
 0x23f   :  { %v4386_v59 = vpop.eup %4385 }
 0x240   :  { %v4388_v42 = vpop.eup %4387  ;;  %v1694_v2 = vmul.f32 %v4386_v59, %v5692_v1 }
 0x241   :  { %v1695_v58 = vmul.f32 %v4388_v42, %v5143_v47 }
 0x242   :  { %1710 = vst.msk [vmem:[%s5642_s4 + $0x50] sm:$0xff] %vm1523_vm11, %v1694_v2  ;;  %4138 = vmatmul.mubr.msk.f32.vlgmr.msra.gmra.mrb[26].mxu0 %vm1523_vm11, %v1694_v2 }
 0x243   :  { %1711 = vst.msk [vmem:[%s5642_s4 + $0x58] sm:$0xff] %vm1523_vm11, %v1695_v58  ;;  %4145 = vmatmul.mubr.msk.f32.vlgmr.msra.gmra.mrb[26].mxu1 %vm1523_vm11, %v1695_v58  ;;  %4277 = vmatpush3.bf16.msra.mxu0 %v5693_v32 }
 0x244   :  { %v1664_v3 = vpop.xlane.xlu1 %1663  ;;  %4280 = vmatpush3.bf16.msra.mxu1 %v5694_v60  ;;  %4151 = vmatprep.mubr.msk.f32.mxu0 %vm4470_vm2, %v5686_v56 }
 0x245   :  { %v1667_v47 = vpop.xlane.xlu0 %1666  ;;  %4393 = vrcp.f32 %v1664_v3  ;;  %4158 = vmatprep.mubr.msk.f32.mxu1 %vm4470_vm2, %v5686_v56  ;;  %4281 = vmatprep.subr.bf16.mxu0 %v5687_v31 }
 0x246   :  { %4395 = vrcp.f32 %v1667_v47  ;;  %4284 = vmatprep.subr.bf16.mxu1 %v5687_v31 }
 0x247   :  { %v4390_v25 = vpop.eup %4389 }
 0x248   :  { %v4392_v44 = vpop.eup %4391  ;;  %v1696_v54 = vmul.f32 %v4390_v25, %v5154_v0  ;;  %v1849_v36 = vpop.permute.xlu1 %1848 }
 0x249   :  { %v1697_v18 = vmul.f32 %v4392_v44, %v5158_v40  ;;  %vm1873_vm6 = vcmp.eq.s32.totalorder %v1849_v36, 1  ;;  %v5696_v40 = vld [vmem:[#allocation7_spill] sm:$0xff] }
 0x24a   :  { %1712 = vst.msk [vmem:[%s5642_s4 + $0x60] sm:$0xff] %vm1523_vm11, %v1696_v54  ;;  %v1889_v14 = vsel %vm1873_vm6, %v5695_v21, -10000.0  ;;  %4152 = vmatmul.mubr.msk.f32.vlgmr.msra.gmra.mrb[28].mxu0 %vm1523_vm11, %v1696_v54 }
 0x24b   :  { %1713 = vst.msk [vmem:[%s5642_s4 + $0x68] sm:$0xff] %vm1523_vm11, %v1697_v18  ;;  %v1971_v0 = vsel %vm1523_vm11, %v1889_v14, -inf  ;;  %4159 = vmatmul.mubr.msk.f32.vlgmr.msra.gmra.mrb[28].mxu1 %vm1523_vm11, %v1697_v18  ;;  %4283 = vmatpush3.bf16.msra.mxu0 %v5696_v40 }
 0x24c   :  { %v1972_v6 = vrot.slane %v1971_v0, 4  ;;  %v1855_v62 = vpop.permute.xlu1 %1854  ;;  %4286 = vmatpush3.bf16.msra.mxu1 %v5697_v13  ;;  %4165 = vmatprep.mubr.msk.f32.mxu0 %vm4470_vm2, %v5686_v56 }
 0x24d   :  { %v1846_v10 = vpop.permute.xlu0 %1845  ;;  %vm1875_vm7 = vcmp.eq.s32.totalorder %v1855_v62, 1  ;;  %4172 = vmatprep.mubr.msk.f32.mxu1 %vm4470_vm2, %v5686_v56 }
 0x24e   :  { %v1973_v27 = vmax.f32 %v1971_v0, %v1972_v6  ;;  %vm1872_vm8 = vcmp.eq.s32.totalorder %v1846_v10, 1  ;;  %v1891_v63 = vsel %vm1875_vm7, %v5698_v9, -10000.0 }
 0x24f   :  { %v4394_v37 = vpop.eup %4393  ;;  %v1888_v33 = vsel %vm1872_vm8, %v5699_v16, -10000.0  ;;  %v1985_v20 = vsel %vm1523_vm11, %v1891_v63, -inf }
 0x250   :  { %v4396_v43 = vpop.eup %4395  ;;  %v1698_v31 = vmul.f32 %v4394_v37, %v5173_v61  ;;  %v1974_v55 = vrot.slane %v1973_v27, 2  ;;  %v1964_v28 = vsel %vm1523_vm11, %v1888_v33, -inf  ;;  %v1986_v4 = vrot.slane %v1985_v20, 4  ;;  %v1861_v22 = vpop.permute.xlu1 %1860 }
 0x251   :  { %v1699_v15 = vmul.f32 %v4396_v43, %v5177_v48  ;;  %v1965_v56 = vrot.slane %v1964_v28, 4  ;;  %v1852_v17 = vpop.permute.xlu0 %1851  ;;  %vm1877_vm2 = vcmp.eq.s32.totalorder %v1861_v22, 1 }
 0x252   :  { %1714 = vst.msk [vmem:[%s5642_s4 + $0x70] sm:$0xff] %vm1523_vm11, %v1698_v31  ;;  %v1975_v5 = vmax.f32 %v1973_v27, %v1974_v55  ;;  %v1987_v57 = vmax.f32 %v1985_v20, %v1986_v4  ;;  %vm1874_vm9 = vcmp.eq.s32.totalorder %v1852_v17, 1  ;;  %v1893_v61 = vsel %vm1877_vm2, %v5700_v23, -10000.0  ;;  %4166 = vmatmul.mubr.msk.f32.vlgmr.msra.gmra.mrb[30].mxu0 %vm1523_vm11, %v1698_v31 }
 0x253   :  { %1715 = vst.msk [vmem:[%s5642_s4 + $0x78] sm:$0xff] %vm1523_vm11, %v1699_v15  ;;  %v1966_v48 = vmax.f32 %v1964_v28, %v1965_v56  ;;  %v1890_v11 = vsel %vm1874_vm9, %v5701_v30, -10000.0  ;;  %v1999_v7 = vsel %vm1523_vm11, %v1893_v61, -inf  ;;  %4173 = vmatmul.mubr.msk.f32.vlgmr.msra.gmra.mrb[30].mxu1 %vm1523_vm11, %v1699_v15 }
 0x254   :  { %v1976_v24 = vrot.slane %v1975_v5, 1  ;;  %v1988_v26 = vrot.slane %v1987_v57, 2  ;;  %v1978_v52 = vsel %vm1523_vm11, %v1890_v11, -inf  ;;  %v2000_v19 = vrot.slane %v1999_v7, 4 }
 0x255   :  { %v1967_v8 = vrot.slane %v1966_v48, 2  ;;  %v1979_v45 = vrot.slane %v1978_v52, 4  ;;  %v1858_v35 = vpop.permute.xlu0 %1857 }
 0x256   :  { %v1977_v38 = vmax.f32 %v1975_v5, %v1976_v24  ;;  %v1989_v12 = vmax.f32 %v1987_v57, %v1988_v26  ;;  %v2001_v34 = vmax.f32 %v1999_v7, %v2000_v19  ;;  %vm1876_vm10 = vcmp.eq.s32.totalorder %v1858_v35, 1 }
 0x257   :  { %v1968_v53 = vmax.f32 %v1966_v48, %v1967_v8  ;;  %v1980_v46 = vmax.f32 %v1978_v52, %v1979_v45  ;;  %v1892_v51 = vsel %vm1876_vm10, %v5702_v29, -10000.0 }
 0x258   :  { %v2017_v49 = vsub.f32 %v1889_v14, %v1977_v38  ;;  %v1990_v39 = vrot.slane %v1989_v12, 1  ;;  %v2002_v41 = vrot.slane %v2001_v34, 2  ;;  %v1992_v50 = vsel %vm1523_vm11, %v1892_v51, -inf }
 0x259   :  { %v1969_v59 = vrot.slane %v1968_v53, 1  ;;  %v1981_v42 = vrot.slane %v1980_v46, 2  ;;  %v1993_v1 = vrot.slane %v1992_v50, 4 }
 0x25a   :  { %v2044_v2 = vmul.f32 1.442695, %v2017_v49  ;;  %v1991_v58 = vmax.f32 %v1989_v12, %v1990_v39  ;;  %v2003_v32 = vmax.f32 %v2001_v34, %v2002_v41 }
 0x25b   :  { %v1970_v3 = vmax.f32 %v1968_v53, %v1969_v59  ;;  %v1982_v60 = vmax.f32 %v1980_v46, %v1981_v42  ;;  %v1994_v47 = vmax.f32 %v1992_v50, %v1993_v1 }
 0x25c   :  { %4397 = vpow2.f32 %v2044_v2  ;;  %v2019_v25 = vsub.f32 %v1891_v63, %v1991_v58  ;;  %v2004_v44 = vrot.slane %v2003_v32, 1 }
 0x25d   :  { %v2016_v54 = vsub.f32 %v1888_v33, %v1970_v3  ;;  %v1983_v36 = vrot.slane %v1982_v60, 1  ;;  %v1995_v18 = vrot.slane %v1994_v47, 2 }
 0x25e   :  { %v2048_v21 = vmul.f32 1.442695, %v2019_v25  ;;  %v2005_v14 = vmax.f32 %v2003_v32, %v2004_v44 }
 0x25f   :  { %v2042_v0 = vmul.f32 1.442695, %v2016_v54  ;;  %v1984_v40 = vmax.f32 %v1982_v60, %v1983_v36  ;;  %v1996_v6 = vmax.f32 %v1994_v47, %v1995_v18 }
 0x260   :  { %4399 = vpow2.f32 %v2048_v21  ;;  %v2021_v62 = vsub.f32 %v1893_v61, %v2005_v14 }
 0x261   :  { %4401 = vpow2.f32 %v2042_v0  ;;  %v2018_v13 = vsub.f32 %v1890_v11, %v1984_v40  ;;  %v1997_v10 = vrot.slane %v1996_v6, 1 }
 0x262   :  { %v2052_v27 = vmul.f32 1.442695, %v2021_v62 }
 0x263   :  { %v2046_v9 = vmul.f32 1.442695, %v2018_v13  ;;  %v1998_v37 = vmax.f32 %v1996_v6, %v1997_v10 }
 0x264   :  { %4403 = vpow2.f32 %v2052_v27 }
 0x265   :  { %4405 = vpow2.f32 %v2046_v9  ;;  %v2020_v63 = vsub.f32 %v1892_v51, %v1998_v37  ;;  %v4453_v9 = vld [vmem:[%s5641_s0] sm:$0x1] }
 0x266   :  { %v4398_v16 = vpop.eup %4397  ;;  %v2182_v37 = vcvt.s32.f32 %v4453_v9 }
 0x267   :  { %v2131_v33 = vsel %vm1523_vm11, %v4398_v16, 0.0  ;;  %v2050_v20 = vmul.f32 1.442695, %v2020_v63 }
 0x268   :  { %v2132_v43 = vrot.slane %v2131_v33, 4 }
 0x269   :  { %4407 = vpow2.f32 %v2050_v20 }
 0x26a   :  { %v4400_v31 = vpop.eup %4399  ;;  %v2133_v55 = vadd.f32 %v2132_v43, %v2131_v33 }
 0x26b   :  { %v4402_v28 = vpop.eup %4401  ;;  %v2145_v4 = vsel %vm1523_vm11, %v4400_v31, 0.0 }
 0x26c   :  { %v2134_v22 = vrot.slane %v2133_v55, 2  ;;  %v2124_v15 = vsel %vm1523_vm11, %v4402_v28, 0.0  ;;  %v2146_v56 = vrot.slane %v2145_v4, 4 }
 0x26d   :  { %v2125_v17 = vrot.slane %v2124_v15, 4 }
 0x26e   :  { %v4404_v5 = vpop.eup %4403  ;;  %v2147_v57 = vadd.f32 %v2146_v56, %v2145_v4  ;;  %v2135_v23 = vadd.f32 %v2134_v22, %v2133_v55  ;;  %v4455_v55 = vld [vmem:[%s5641_s0 + $0x2] sm:$0x1]  ;;  %v4456_v22 = vld [vmem:[%s5641_s0 + $0x4] sm:$0x1] }
 0x26f   :  { %v4406_v61 = vpop.eup %4405  ;;  %v2126_v48 = vadd.f32 %v2125_v17, %v2124_v15  ;;  %v2159_v30 = vsel %vm1523_vm11, %v4404_v5, 0.0  ;;  %v2186_v15 = vcvt.s32.f32 %v4456_v22  ;;  %v4457_v17 = vld [vmem:[%s5641_s0 + $0x3] sm:$0x1]  ;;  %v4463_v22 = vld [vmem:[%s5641_s0 + $0xb] sm:$0x1] }
 0x270   :  { %v2148_v11 = vrot.slane %v2147_v57, 2  ;;  %v2138_v7 = vsel %vm1523_vm11, %v4406_v61, 0.0  ;;  %v2160_v24 = vrot.slane %v2159_v30, 4  ;;  %v2136_v26 = vrot.slane %v2135_v23, 1 }
 0x271   :  { %v2127_v52 = vrot.slane %v2126_v48, 2  ;;  %v2139_v19 = vrot.slane %v2138_v7, 4 }
 0x272   :  { %v2161_v8 = vadd.f32 %v2160_v24, %v2159_v30  ;;  %v2137_v45 = vadd.f32 %v2136_v26, %v2135_v23  ;;  %v2149_v35 = vadd.f32 %v2148_v11, %v2147_v57  ;;  %v4458_v57 = vld [vmem:[%s5641_s0 + $0x6] sm:$0x1]  ;;  %v4460_v11 = vld [vmem:[%s5641_s0 + $0x8] sm:$0x1] }
 0x273   :  { %v4408_v38 = vpop.eup %4407  ;;  %v2140_v12 = vadd.f32 %v2139_v19, %v2138_v7  ;;  %v2128_v34 = vadd.f32 %v2127_v52, %v2126_v48  ;;  %v2188_v23 = vcvt.s32.f32 %v4458_v57  ;;  %v4459_v48 = vld [vmem:[%s5641_s0 + $0x5] sm:$0x1]  ;;  %v2190_v7 = vcvt.s32.f32 %v4460_v11  ;;  %v4466_v11 = vld [vmem:[%s5641_s0 + $0xf] sm:$0x1] }
 0x274   :  { %v2162_v53 = vrot.slane %v2161_v8, 2  ;;  %v2152_v46 = vsel %vm1523_vm11, %v4408_v38, 0.0  ;;  %4409 = vrcp.f32 %v2137_v45  ;;  %v2150_v29 = vrot.slane %v2149_v35, 1 }
 0x275   :  { %v2141_v51 = vrot.slane %v2140_v12, 2  ;;  %v2153_v49 = vrot.slane %v2152_v46, 4  ;;  %v2129_v39 = vrot.slane %v2128_v34, 1  ;;  %v2187_v30 = vcvt.s32.f32 %v4459_v48 }
 0x276   :  { %v2151_v41 = vadd.f32 %v2150_v29, %v2149_v35  ;;  %v2163_v50 = vadd.f32 %v2162_v53, %v2161_v8  ;;  %v4461_v8 = vld [vmem:[%s5641_s0 + $0x7] sm:$0x1]  ;;  %v4462_v29 = vld [vmem:[%s5641_s0 + $0x9] sm:$0x1] }
 0x277   :  { %v2154_v59 = vadd.f32 %v2153_v49, %v2152_v46  ;;  %v2130_v42 = vadd.f32 %v2129_v39, %v2128_v34  ;;  %v2142_v1 = vadd.f32 %v2141_v51, %v2140_v12  ;;  %v2189_v45 = vcvt.s32.f32 %v4461_v8 }
 0x278   :  { %4411 = vrcp.f32 %v2151_v41  ;;  %v2164_v2 = vrot.slane %v2163_v50, 1  ;;  %v2191_v51 = vcvt.s32.f32 %v4462_v29 }
 0x279   :  { %v2155_v58 = vrot.slane %v2154_v59, 2  ;;  %4413 = vrcp.f32 %v2130_v42  ;;  %v2143_v32 = vrot.slane %v2142_v1, 1 }
 0x27a   :  { %v2165_v3 = vadd.f32 %v2164_v2, %v2163_v50 }
 0x27b   :  { %v2144_v60 = vadd.f32 %v2143_v32, %v2142_v1  ;;  %v2156_v47 = vadd.f32 %v2155_v58, %v2154_v59 }
 0x27c   :  { %4415 = vrcp.f32 %v2165_v3 }
 0x27d   :  { %4417 = vrcp.f32 %v2144_v60  ;;  %v2157_v25 = vrot.slane %v2156_v47, 1 }
 0x27e   :  { %v4410_v44 = vpop.eup %4409 }
 0x27f   :  { %v2225_v54 = vmul.f32 %v4410_v44, %v4398_v16  ;;  %v2158_v36 = vadd.f32 %v2157_v25, %v2156_v47  ;;  %v4454_v16 = vld [vmem:[%s5641_s0 + $0x1] sm:$0x1] }
 0x280   :  { %v2183_v33 = vcvt.s32.f32 %v4454_v16 }
 0x281   :  { %v2263_v18 = vsel %vm1523_vm11, %v2225_v54, 0.0  ;;  %4419 = vrcp.f32 %v2158_v36  ;;  %v2235_v24 = vpop.xlane.xlu1 %2234 }
 0x282   :  { %v4412_v21 = vpop.eup %4411  ;;  %2264 = vadd.xlane.f32.xlu0 %v2263_v18  ;;  %4421 = vrcp.f32 %v2182_v37 }
 0x283   :  { %v4414_v14 = vpop.eup %4413  ;;  %v2227_v0 = vmul.f32 %v4412_v21, %v4400_v31  ;;  %4423 = vrcp.f32 %v2183_v33 }
 0x284   :  { %v2224_v40 = vmul.f32 %v4414_v14, %v4402_v28  ;;  %v2184_v28 = vcvt.s32.f32 %v4455_v55 }
 0x285   :  { %v2269_v6 = vsel %vm1523_vm11, %v2227_v0, 0.0  ;;  %v2244_v46 = vpop.xlane.xlu1 %2243 }
 0x286   :  { %v4416_v62 = vpop.eup %4415  ;;  %v2260_v13 = vsel %vm1523_vm11, %v2224_v40, 0.0  ;;  %2270 = vadd.xlane.f32.xlu0 %v2269_v6  ;;  %4425 = vrcp.f32 %v2184_v28 }
 0x287   :  { %v4418_v10 = vpop.eup %4417  ;;  %2261 = vadd.xlane.f32.xlu1 %v2260_v13  ;;  %v2229_v27 = vmul.f32 %v4416_v62, %v4404_v5  ;;  %v2185_v5 = vcvt.s32.f32 %v4457_v17  ;;  %4427 = vrcp.f32 %v2186_v15  ;;  %v2193_v15 = vcvt.s32.f32 %v4463_v22 }
 0x288   :  { %v2226_v63 = vmul.f32 %v4418_v10, %v4406_v61  ;;  %v2232_v61 = vpop.xlane.xlu0 %2231 }
 0x289   :  { %v2275_v20 = vsel %vm1523_vm11, %v2229_v27, 0.0  ;;  %4429 = vrcp.f32 %v2185_v5  ;;  %v2250_v2 = vpop.xlane.xlu1 %2249  ;;  %v4465_v5 = vld [vmem:[%s5641_s0 + $0xa] sm:$0x1] }
 0x28a   :  { %v2266_v43 = vsel %vm1523_vm11, %v2226_v63, 0.0  ;;  %2276 = vadd.xlane.f32.xlu0 %v2275_v20  ;;  %4431 = vrcp.f32 %v2188_v23  ;;  %v2192_v57 = vcvt.s32.f32 %v4465_v5 }
 0x28b   :  { %v4420_v31 = vpop.eup %4419  ;;  %2267 = vadd.xlane.f32.xlu1 %v2266_v43  ;;  %4433 = vrcp.f32 %v2187_v30 }
 0x28c   :  { %v2228_v4 = vmul.f32 %v4420_v31, %v4408_v38  ;;  %v4422_v26 = vpop.eup %4421  ;;  %v2238_v19 = vpop.xlane.xlu0 %2237  ;;  %4435 = vrcp.f32 %v2190_v7  ;;  %v5703_v38 = vld [vmem:[#allocation4_spill] sm:$0xff]  ;;  %v2197_v7 = vcvt.s32.f32 %v4466_v11 }
 0x28d   :  { %v4424_v52 = vpop.eup %4423  ;;  %v2297_v12 = vrot.slane %v4422_v26, %v5703_v38  ;;  %4437 = vrcp.f32 %v2189_v45  ;;  %v2256_v0 = vpop.xlane.xlu1 %2255 }
 0x28e   :  { %v2272_v56 = vsel %vm1523_vm11, %v2228_v4, 0.0  ;;  %v2301_v34 = vrot.slane %v4424_v52, %v5703_v38  ;;  %4439 = vrcp.f32 %v2191_v51  ;;  %vm3766_vm11 = vcmask 253952  }
 0x28f   :  { %2273 = vadd.xlane.f32.xlu1 %v2272_v56  ;;  %v2374_v41 = vmul.f32 %v2297_v12, %v2232_v61  ;;  %4441 = vrcp.f32 %v2193_v15  ;;  %v4464_v56 = vld [vmem:[%s5641_s0 + $0xd] sm:$0x1] }
 0x290   :  { %v4426_v35 = vpop.eup %4425  ;;  %v2241_v49 = vpop.xlane.xlu0 %2240  ;;  %v2375_v50 = vmul.f32 %v2301_v34, %v2235_v24  ;;  %v2195_v17 = vcvt.s32.f32 %v4464_v56  ;;  %v4467_v24 = vld [vmem:[%s5641_s0 + $0xc] sm:$0x1] }
 0x291   :  { %v4428_v53 = vpop.eup %4427  ;;  %v2305_v59 = vrot.slane %v4426_v35, %v5703_v38  ;;  %v2194_v26 = vcvt.s32.f32 %v4467_v24  ;;  %v4468_v35 = vld [vmem:[%s5641_s0 + $0xe] sm:$0x1] }
 0x292   :  { %v2313_v42 = vrot.slane %v4428_v53, %v5703_v38  ;;  %4443 = vrcp.f32 %v2195_v17  ;;  %v2196_v12 = vcvt.s32.f32 %v4468_v35 }
 0x293   :  { %v4430_v39 = vpop.eup %4429  ;;  %v2376_v32 = vmul.f32 %v2305_v59, %v2238_v19  ;;  %4445 = vrcp.f32 %v2192_v57 }
 0x294   :  { %v4432_v1 = vpop.eup %4431  ;;  %v2378_v3 = vmul.f32 %v2313_v42, %v2244_v46  ;;  %v2309_v60 = vrot.slane %v4430_v39, %v5703_v38  ;;  %v2247_v44 = vpop.xlane.xlu0 %2246  ;;  %4447 = vrcp.f32 %v2197_v7 }
 0x295   :  { %v4434_v58 = vpop.eup %4433  ;;  %v2321_v47 = vrot.slane %v4432_v1, %v5703_v38  ;;  %4449 = vrcp.f32 %v2194_v26 }
 0x296   :  { %v4436_v25 = vpop.eup %4435  ;;  %v2377_v54 = vmul.f32 %v2309_v60, %v2241_v49  ;;  %v2317_v18 = vrot.slane %v4434_v58, %v5703_v38  ;;  %4451 = vrcp.f32 %v2196_v12 }
 0x297   :  { %v2380_v36 = vmul.f32 %v2321_v47, %v2250_v2  ;;  %v2329_v21 = vrot.slane %v4436_v25, %v5703_v38  ;;  %v4438_v14 = vpop.eup %4437 }
 0x298   :  { %v2253_v40 = vpop.xlane.xlu0 %2252  ;;  %v2379_v6 = vmul.f32 %v2317_v18, %v2247_v44  ;;  %v2325_v13 = vrot.slane %v4438_v14, %v5703_v38  ;;  %v4440_v10 = vpop.eup %4439 }
 0x299   :  { %v2382_v62 = vmul.f32 %v2329_v21, %v2256_v0  ;;  %v2333_v9 = vrot.slane %v4440_v10, %v5703_v38  ;;  %v4442_v34 = vpop.eup %4441 }
 0x29a   :  { %v2381_v27 = vmul.f32 %v2325_v13, %v2253_v40  ;;  %v2341_v53 = vrot.slane %v4442_v34, %v5703_v38 }
 0x29c   :  { %v2259_v37 = vpop.xlane.xlu0 %2258  ;;  %v4444_v46 = vpop.eup %4443 }
 0x29d   :  { %v2383_v63 = vmul.f32 %v2333_v9, %v2259_v37  ;;  %v4446_v51 = vpop.eup %4445  ;;  %v2349_v42 = vrot.slane %v4444_v46, %v5703_v38 }
 0x29e   :  { %v4448_v1 = vpop.eup %4447  ;;  %v2337_v2 = vrot.slane %v4446_v51, %v5703_v38 }
 0x29f   :  { %v4450_v58 = vpop.eup %4449  ;;  %v2357_v47 = vrot.slane %v4448_v1, %v5703_v38 }
 0x2a0   :  { %3560 = vperm.xlu1 %4292, %v2374_v41   ;;  %3565 = vperm.xlu0 %4291, %v2375_v50  }
 0x2a4   :  { %3570 = vperm.xlu1 %4292, %v2376_v32   ;;  %3580 = vperm.xlu0 %4291, %v2378_v3  }
 0x2a8   :  { %3575 = vperm.xlu1 %4292, %v2377_v54   ;;  %3590 = vperm.xlu0 %4291, %v2380_v36   ;;  %v2345_v54 = vrot.slane %v4450_v58, %v5703_v38  ;;  %v4452_v36 = vpop.eup %4451 }
 0x2a9   :  { %v2353_v13 = vrot.slane %v4452_v36, %v5703_v38 }
 0x2ac   :  { %3585 = vperm.xlu1 %4292, %v2379_v6   ;;  %3600 = vperm.xlu0 %4291, %v2382_v62  }
 0x2b0   :  { %3595 = vperm.xlu1 %4292, %v2381_v27  }
 0x2b4   :  { %3605 = vperm.xlu1 %4292, %v2383_v63  }
 0x2ed   :  { %v5487_v16 = vpop.f32.mrb[16].mxu0 }
 0x2ee   :  { %v5489_v33 = vpop.f32.mrb[16].mxu1  ;;  %v4069_v20 = vpop.f32.mrb[17].mxu0 }
 0x2ef   :  { %v4076_v43 = vpop.f32.mrb[17].mxu1 }
 0x2f5   :  { %v5491_v31 = vpop.f32.mrb[18].mxu0 }
 0x2f6   :  { %v4083_v55 = vpop.f32.mrb[19].mxu0 }
 0x2f9   :  { %v5493_v28 = vpop.f32.mrb[18].mxu1 }
 0x2fa   :  { %v4090_v4 = vpop.f32.mrb[19].mxu1 }
 0x2fe   :  { %v5504_v23 = vpop.f32.mrb[20].mxu1 }
 0x2ff   :  { %v5506_v61 = vpop.f32.mrb[20].mxu0  ;;  %v4104_v48 = vpop.f32.mrb[21].mxu1 }
 0x300   :  { %v4097_v30 = vpop.f32.mrb[21].mxu0 }
 0x305   :  { %v5514_v52 = vpop.f32.mrb[22].mxu0 }
 0x306   :  { %v5516_v19 = vpop.f32.mrb[22].mxu1  ;;  %v4111_v8 = vpop.f32.mrb[23].mxu0 }
 0x307   :  { %v4118_v45 = vpop.f32.mrb[23].mxu1 }
 0x30d   :  { %v5522_v29 = vpop.f32.mrb[24].mxu0 }
 0x30e   :  { %v5524_v49 = vpop.f32.mrb[24].mxu1  ;;  %v4125_v39 = vpop.f32.mrb[25].mxu0 }
 0x30f   :  { %v4132_v41 = vpop.f32.mrb[25].mxu1  ;;  %v2265_v50 = vpop.xlane.xlu0 %2264 }
 0x310   :  { %v2385_v59 = vmul.f32 %v2341_v53, %v2265_v50 }
 0x312   :  { %3615 = vperm.xlu1 %4292, %v2385_v59  }
 0x313   :  { %v2271_v32 = vpop.xlane.xlu0 %2270 }
 0x314   :  { %v2387_v3 = vmul.f32 %v2349_v42, %v2271_v32  ;;  %v2262_v60 = vpop.xlane.xlu1 %2261 }
 0x315   :  { %v2384_v25 = vmul.f32 %v2337_v2, %v2262_v60  ;;  %v5529_v44 = vpop.f32.mrb[26].mxu0 }
 0x316   :  { %v5532_v18 = vpop.f32.mrb[26].mxu1  ;;  %v4139_v21 = vpop.f32.mrb[27].mxu0  ;;  %3625 = vperm.xlu1 %4292, %v2387_v3  }
 0x317   :  { %v4146_v14 = vpop.f32.mrb[27].mxu1  ;;  %3610 = vperm.xlu0 %4291, %v2384_v25   ;;  %v2277_v0 = vpop.xlane.xlu0 %2276 }
 0x318   :  { %v2389_v40 = vmul.f32 %v2357_v47, %v2277_v0  ;;  %v2268_v6 = vpop.xlane.xlu1 %2267 }
 0x319   :  { %v2386_v62 = vmul.f32 %v2345_v54, %v2268_v6 }
 0x31a   :  { %3635 = vperm.xlu1 %4292, %v2389_v40  }
 0x31b   :  { %3620 = vperm.xlu0 %4291, %v2386_v62  }
 0x31c   :  { %v2274_v10 = vpop.xlane.xlu1 %2273 }
 0x31d   :  { %v2388_v27 = vmul.f32 %v2353_v13, %v2274_v10  ;;  %v5535_v9 = vpop.f32.mrb[28].mxu0 }
 0x31e   :  { %v5537_v37 = vpop.f32.mrb[28].mxu1  ;;  %v4153_v63 = vpop.f32.mrb[29].mxu0 }
 0x31f   :  { %v4160_v20 = vpop.f32.mrb[29].mxu1  ;;  %3630 = vperm.xlu0 %4291, %v2388_v27   ;;  %v3566_v43 = vpop.permute.xlu0 %3565 }
 0x320   :  { %v3639_v55 = vmul.f32 %v3566_v43, %v5489_v33  ;;  %v3561_v4 = vpop.permute.xlu1 %3560 }
 0x321   :  { %v3638_v22 = vmul.f32 %v3561_v4, %v5487_v16 }
 0x322   :  { %v3661_v15 = vsel %vm80_vm0, %v3639_v55, 0.0 }
 0x323   :  { %v3662_v38 = vrot.slane %v3661_v15, 4  ;;  %v3654_v56 = vsel %vm80_vm0, %v3638_v22, 0.0  ;;  %v3581_v17 = vpop.permute.xlu0 %3580 }
 0x324   :  { %v3655_v5 = vrot.slane %v3654_v56, 4  ;;  %v3642_v57 = vmul.f32 %v3581_v17, %v5506_v61  ;;  %v3571_v48 = vpop.permute.xlu1 %3570 }
 0x325   :  { %v3663_v30 = vadd.f32 %v3662_v38, %v3661_v15  ;;  %v3640_v11 = vmul.f32 %v3571_v48, %v5491_v31  ;;  %v5545_v7 = vpop.f32.mrb[30].mxu0 }
 0x326   :  { %v3656_v24 = vadd.f32 %v3655_v5, %v3654_v56  ;;  %v3682_v33 = vsel %vm80_vm0, %v3642_v57, 0.0  ;;  %v5548_v26 = vpop.f32.mrb[30].mxu1  ;;  %v4167_v16 = vpop.f32.mrb[31].mxu0 }
 0x327   :  { %v3664_v8 = vrot.slane %v3663_v30, 2  ;;  %v3683_v45 = vrot.slane %v3682_v33, 4  ;;  %v3668_v35 = vsel %vm80_vm0, %v3640_v11, 0.0  ;;  %v4174_v12 = vpop.f32.mrb[31].mxu1  ;;  %v3591_v34 = vpop.permute.xlu0 %3590 }
 0x328   :  { %v3657_v53 = vrot.slane %v3656_v24, 2  ;;  %v3669_v61 = vrot.slane %v3668_v35, 4  ;;  %v3644_v46 = vmul.f32 %v3591_v34, %v5514_v52  ;;  %v3576_v51 = vpop.permute.xlu1 %3575 }
 0x329   :  { %v3665_v31 = vadd.f32 %v3664_v8, %v3663_v30  ;;  %v3684_v39 = vadd.f32 %v3683_v45, %v3682_v33  ;;  %v3641_v41 = vmul.f32 %v3576_v51, %v5493_v28 }
 0x32a   :  { %v3658_v50 = vadd.f32 %v3657_v53, %v3656_v24  ;;  %v3670_v59 = vadd.f32 %v3669_v61, %v3668_v35  ;;  %v3696_v42 = vsel %vm80_vm0, %v3644_v46, 0.0 }
 0x32b   :  { %v3666_v1 = vrot.slane %v3665_v31, 1  ;;  %v3685_v2 = vrot.slane %v3684_v39, 2  ;;  %v3697_v58 = vrot.slane %v3696_v42, 4  ;;  %v3675_v32 = vsel %vm80_vm0, %v3641_v41, 0.0  ;;  %v3601_v3 = vpop.permute.xlu0 %3600 }
 0x32c   :  { %v3659_v60 = vrot.slane %v3658_v50, 1  ;;  %v3671_v47 = vrot.slane %v3670_v59, 2  ;;  %v3676_v25 = vrot.slane %v3675_v32, 4  ;;  %v3646_v52 = vmul.f32 %v3601_v3, %v5522_v29  ;;  %v3586_v54 = vpop.permute.xlu1 %3585 }
 0x32d   :  { %v3667_v36 = vadd.f32 %v3666_v1, %v3665_v31  ;;  %v3686_v21 = vadd.f32 %v3685_v2, %v3684_v39  ;;  %v3698_v28 = vadd.f32 %v3697_v58, %v3696_v42  ;;  %v3643_v14 = vmul.f32 %v3586_v54, %v5504_v23 }
 0x32e   :  { %v3660_v0 = vadd.f32 %v3659_v60, %v3658_v50  ;;  %v3672_v40 = vadd.f32 %v3671_v47, %v3670_v59  ;;  %v3677_v6 = vadd.f32 %v3676_v25, %v3675_v32  ;;  %v3710_v62 = vsel %vm80_vm0, %v3646_v52, 0.0 }
 0x32f   :  { %3768 = vst.msk [vmem:[%s5643_s3 + $0x1] sm:$0x1] %vm3766_vm11, %v3667_v36  ;;  %v3687_v13 = vrot.slane %v3686_v21, 1  ;;  %v3699_v10 = vrot.slane %v3698_v28, 2  ;;  %v3711_v27 = vrot.slane %v3710_v62, 4  ;;  %v3689_v29 = vsel %vm80_vm0, %v3643_v14, 0.0 }
 0x330   :  { %3767 = vst.msk [vmem:[%s5643_s3] sm:$0x1] %vm3766_vm11, %v3660_v0  ;;  %v3673_v23 = vrot.slane %v3672_v40, 1  ;;  %v3678_v63 = vrot.slane %v3677_v6, 2  ;;  %v3690_v20 = vrot.slane %v3689_v29, 4  ;;  %v3596_v43 = vpop.permute.xlu1 %3595 }
 0x331   :  { %v3688_v55 = vadd.f32 %v3687_v13, %v3686_v21  ;;  %v3700_v4 = vadd.f32 %v3699_v10, %v3698_v28  ;;  %v3712_v22 = vadd.f32 %v3711_v27, %v3710_v62  ;;  %v3645_v15 = vmul.f32 %v3596_v43, %v5516_v19 }
 0x332   :  { %v3674_v38 = vadd.f32 %v3673_v23, %v3672_v40  ;;  %v3679_v56 = vadd.f32 %v3678_v63, %v3677_v6  ;;  %v3691_v17 = vadd.f32 %v3690_v20, %v3689_v29 }
 0x333   :  { %3771 = vst.msk [vmem:[%s5643_s3 + $0x4] sm:$0x1] %vm3766_vm11, %v3688_v55  ;;  %v3701_v5 = vrot.slane %v3700_v4, 1  ;;  %v3713_v57 = vrot.slane %v3712_v22, 2  ;;  %v3703_v48 = vsel %vm80_vm0, %v3645_v15, 0.0 }
 0x334   :  { %3769 = vst.msk [vmem:[%s5643_s3 + $0x2] sm:$0x1] %vm3766_vm11, %v3674_v38  ;;  %v3680_v30 = vrot.slane %v3679_v56, 1  ;;  %v3692_v11 = vrot.slane %v3691_v17, 2  ;;  %v3704_v19 = vrot.slane %v3703_v48, 4  ;;  %v3606_v24 = vpop.permute.xlu1 %3605 }
 0x335   :  { %v3702_v33 = vadd.f32 %v3701_v5, %v3700_v4  ;;  %v3714_v16 = vadd.f32 %v3713_v57, %v3712_v22  ;;  %v3647_v8 = vmul.f32 %v3606_v24, %v5524_v49 }
 0x336   :  { %v3681_v45 = vadd.f32 %v3680_v30, %v3679_v56  ;;  %v3693_v35 = vadd.f32 %v3692_v11, %v3691_v17  ;;  %v3705_v12 = vadd.f32 %v3704_v19, %v3703_v48 }
 0x337   :  { %3773 = vst.msk [vmem:[%s5643_s3 + $0x6] sm:$0x1] %vm3766_vm11, %v3702_v33  ;;  %v3715_v34 = vrot.slane %v3714_v16, 1  ;;  %v3717_v53 = vsel %vm80_vm0, %v3647_v8, 0.0 }
 0x338   :  { %3770 = vst.msk [vmem:[%s5643_s3 + $0x3] sm:$0x1] %vm3766_vm11, %v3681_v45  ;;  %v3694_v61 = vrot.slane %v3693_v35, 1  ;;  %v3706_v46 = vrot.slane %v3705_v12, 2  ;;  %v3718_v51 = vrot.slane %v3717_v53, 4 }
 0x339   :  { %v3716_v49 = vadd.f32 %v3715_v34, %v3714_v16 }
 0x33a   :  { %v3695_v31 = vadd.f32 %v3694_v61, %v3693_v35  ;;  %v3707_v39 = vadd.f32 %v3706_v46, %v3705_v12  ;;  %v3719_v41 = vadd.f32 %v3718_v51, %v3717_v53 }
 0x33b   :  { %3775 = vst.msk [vmem:[%s5643_s3 + $0x8] sm:$0x1] %vm3766_vm11, %v3716_v49 }
 0x33c   :  { %3772 = vst.msk [vmem:[%s5643_s3 + $0x5] sm:$0x1] %vm3766_vm11, %v3695_v31  ;;  %v3708_v50 = vrot.slane %v3707_v39, 1  ;;  %v3720_v59 = vrot.slane %v3719_v41, 2 }
 0x33e   :  { %v3709_v42 = vadd.f32 %v3708_v50, %v3707_v39  ;;  %v3721_v1 = vadd.f32 %v3720_v59, %v3719_v41 }
 0x340   :  { %3774 = vst.msk [vmem:[%s5643_s3 + $0x7] sm:$0x1] %vm3766_vm11, %v3709_v42  ;;  %v3722_v2 = vrot.slane %v3721_v1, 1 }
 0x342   :  { %v3723_v58 = vadd.f32 %v3722_v2, %v3721_v1 }
 0x344   :  { %3776 = vst.msk [vmem:[%s5643_s3 + $0x9] sm:$0x1] %vm3766_vm11, %v3723_v58 }
 0x391   :  { %v3616_v32 = vpop.permute.xlu1 %3615 }
 0x392   :  { %v3649_v3 = vmul.f32 %v3616_v32, %v5532_v18 }
 0x394   :  { %v3731_v60 = vsel %vm80_vm0, %v3649_v3, 0.0 }
 0x395   :  { %v3732_v47 = vrot.slane %v3731_v60, 4  ;;  %v3626_v25 = vpop.permute.xlu1 %3625 }
 0x396   :  { %v3611_v52 = vpop.permute.xlu0 %3610  ;;  %v3651_v54 = vmul.f32 %v3626_v25, %v5537_v37 }
 0x397   :  { %v3733_v36 = vadd.f32 %v3732_v47, %v3731_v60  ;;  %v3648_v21 = vmul.f32 %v3611_v52, %v5529_v44 }
 0x398   :  { %v3745_v28 = vsel %vm80_vm0, %v3651_v54, 0.0 }
 0x399   :  { %v3734_v14 = vrot.slane %v3733_v36, 2  ;;  %v3724_v0 = vsel %vm80_vm0, %v3648_v21, 0.0  ;;  %v3746_v40 = vrot.slane %v3745_v28, 4  ;;  %v3636_v6 = vpop.permute.xlu1 %3635 }
 0x39a   :  { %v3725_v62 = vrot.slane %v3724_v0, 4  ;;  %v3621_v13 = vpop.permute.xlu0 %3620  ;;  %v3653_v18 = vmul.f32 %v3636_v6, %v5548_v26 }
 0x39b   :  { %v3735_v10 = vadd.f32 %v3734_v14, %v3733_v36  ;;  %v3747_v27 = vadd.f32 %v3746_v40, %v3745_v28  ;;  %v3650_v29 = vmul.f32 %v3621_v13, %v5535_v9 }
 0x39c   :  { %v3726_v23 = vadd.f32 %v3725_v62, %v3724_v0  ;;  %v3759_v37 = vsel %vm80_vm0, %v3653_v18, 0.0 }
 0x39d   :  { %v3736_v63 = vrot.slane %v3735_v10, 1  ;;  %v3748_v44 = vrot.slane %v3747_v27, 2  ;;  %v3738_v20 = vsel %vm80_vm0, %v3650_v29, 0.0  ;;  %v3760_v43 = vrot.slane %v3759_v37, 4 }
 0x39e   :  { %v3727_v55 = vrot.slane %v3726_v23, 2  ;;  %v3739_v4 = vrot.slane %v3738_v20, 4  ;;  %v3631_v22 = vpop.permute.xlu0 %3630 }
 0x39f   :  { %v3737_v15 = vadd.f32 %v3736_v63, %v3735_v10  ;;  %v3749_v38 = vadd.f32 %v3748_v44, %v3747_v27  ;;  %v3761_v56 = vadd.f32 %v3760_v43, %v3759_v37  ;;  %v3652_v26 = vmul.f32 %v3631_v22, %v5545_v7 }
 0x3a0   :  { %v3728_v17 = vadd.f32 %v3727_v55, %v3726_v23  ;;  %v3740_v5 = vadd.f32 %v3739_v4, %v3738_v20 }
 0x3a1   :  { %3778 = vst.msk [vmem:[%s5643_s3 + $0xb] sm:$0x1] %vm3766_vm11, %v3737_v15  ;;  %v3750_v9 = vrot.slane %v3749_v38, 1  ;;  %v3762_v57 = vrot.slane %v3761_v56, 2  ;;  %v3752_v48 = vsel %vm80_vm0, %v3652_v26, 0.0 }
 0x3a2   :  { %v3729_v30 = vrot.slane %v3728_v17, 1  ;;  %v3741_v11 = vrot.slane %v3740_v5, 2  ;;  %v3753_v19 = vrot.slane %v3752_v48, 4 }
 0x3a3   :  { %v3751_v24 = vadd.f32 %v3750_v9, %v3749_v38  ;;  %v3763_v33 = vadd.f32 %v3762_v57, %v3761_v56 }
 0x3a4   :  { %v3730_v16 = vadd.f32 %v3729_v30, %v3728_v17  ;;  %v3742_v8 = vadd.f32 %v3741_v11, %v3740_v5  ;;  %v3754_v45 = vadd.f32 %v3753_v19, %v3752_v48 }
 0x3a5   :  { %3780 = vst.msk [vmem:[%s5643_s3 + $0xd] sm:$0x1] %vm3766_vm11, %v3751_v24  ;;  %v3764_v7 = vrot.slane %v3763_v33, 1 }
 0x3a6   :  { %3777 = vst.msk [vmem:[%s5643_s3 + $0xa] sm:$0x1] %vm3766_vm11, %v3730_v16  ;;  %v3743_v35 = vrot.slane %v3742_v8, 1  ;;  %v3755_v12 = vrot.slane %v3754_v45, 2 }
 0x3a7   :  { %v3765_v34 = vadd.f32 %v3764_v7, %v3763_v33 }
 0x3a8   :  { %v3744_v53 = vadd.f32 %v3743_v35, %v3742_v8  ;;  %v3756_v61 = vadd.f32 %v3755_v12, %v3754_v45 }
 0x3a9   :  { %3782 = vst.msk [vmem:[%s5643_s3 + $0xf] sm:$0x1] %vm3766_vm11, %v3765_v34 }
 0x3aa   :  { %3779 = vst.msk [vmem:[%s5643_s3 + $0xc] sm:$0x1] %vm3766_vm11, %v3744_v53  ;;  %v3757_v46 = vrot.slane %v3756_v61, 1 }
 0x3ac   :  { %v3758_v51 = vadd.f32 %v3757_v46, %v3756_v61 }
 0x3ae   :  { %3781 = vst.msk [vmem:[%s5643_s3 + $0xe] sm:$0x1] %vm3766_vm11, %v3758_v51 }

</bundles_post_ra>
